<compile_context>
chip_gen: v7x
topology: tpu7x:2x2x1
jax: 0.10.0
libtpu: 0.0.40
codegen_flags: <defaults>
</compile_context>

<pallas_src>
import functools
import math

import jax
import jax.numpy as jnp
from jax.experimental import pallas as pl
from jax.experimental.pallas import tpu as pltpu


def closest_factors(n):
    root = int(math.isqrt(n))
    for i in range(root, 0, -1):
        if n % i == 0:
            return (n // i, i)
    return (n, 1)


def _cdiv(a, b):
    return -(-a // b)


def _round_up(a, b):
    return _cdiv(a, b) * b


def _padded_bytes(shape, dtype):
    """VMEM footprint of an array padded to the (sublane, 128-lane) tiling."""
    bpe = jnp.dtype(dtype).itemsize
    dims = list(shape)
    if len(dims) == 1:
        dims = [1] + dims
    sublane = 8 * max(1, 4 // bpe)
    dims[-1] = _round_up(dims[-1], 128)
    dims[-2] = _round_up(dims[-2], sublane)
    n = 1
    for d in dims:
        n *= d
    return n * bpe


def _vmem_capacity_bytes():
    """Physical VMEM per core; conservative 64 MiB (v7x) fallback."""
    try:
        info = pltpu.get_tpu_info()
        for name in ("vmem_capacity_bytes", "vmem_size_bytes", "vmem_bytes"):
            cap = getattr(info, name, None)
            if cap:
                return int(cap)
    except Exception:
        pass
    return 64 * 1024 * 1024


def _pick_batch_tile(B, per_row_bytes, fixed_bytes, vmem_budget,
                     requested=None, cap=512):
    if requested is not None:
        return max(8, min(_round_up(B, 8), _round_up(int(requested), 8)))
    bt = min(cap, _round_up(B, 8))
    # Keep >= 2 grid steps once B is big enough so both v7x TensorCores (and
    # megacore on v5e/v6e) get work on the single "parallel" axis.
    if B >= 16:
        bt = min(bt, max(8, (B // 2) // 8 * 8))
    # Fit the per-tile blocks + staging scratch next to the resident weights.
    avail = max(vmem_budget - fixed_bytes, 2 * 1024 * 1024)
    bt_fit = max(8, int(avail // max(per_row_bytes, 1)) // 8 * 8)
    return max(8, min(bt, bt_fit))


# ----------------------------- Pallas kernel ------------------------------ #

def _btt_kernel(x_ref, w1_ref, w2_ref, o_ref, t_ref, *,
                m1, m2, n1, n2, r, unroll_threshold):
    """One batch tile.

    x_ref : (bt, m2*m1)      flat, lane-dense input tile
    w1_ref: (m2, m1, n1*r)   first TT factor (natural torch layout, resident)
    w2_ref: (n1, m2*r, n2)   second TT factor (natural torch layout, resident)
    o_ref : (bt, n1*n2)      flat, lane-dense output tile (torch flat layout)
    t_ref : (n1, bt, m2*r)   VMEM staging scratch: stage-1 results, laid out so
                             stage 2 reads a contiguous slab with K = m2*r.
    """
    w_dtype = w1_ref.dtype

    # ---- stage 1: per i2, one (bt, m1) @ (m1, n1*r) matmul; lane-scatter ----
    def stage1_static(i2):
        xs = x_ref[:, i2 * m1:(i2 + 1) * m1].astype(w_dtype)
        t = jnp.dot(xs, w1_ref[i2], preferred_element_type=jnp.float32)
        t = t.astype(t_ref.dtype)
        for j1 in range(n1):
            t_ref[j1, :, i2 * r:(i2 + 1) * r] = t[:, j1 * r:(j1 + 1) * r]

    def stage1_dyn(i2, carry):
        start = pl.multiple_of(i2 * m1, m1)
        xs = x_ref[:, pl.ds(start, m1)].astype(w_dtype)
        t = jnp.dot(xs, w1_ref[i2], preferred_element_type=jnp.float32)
        t = t.astype(t_ref.dtype)
        col = pl.multiple_of(i2 * r, r)
        for j1 in range(n1):
            t_ref[j1, :, pl.ds(col, r)] = t[:, j1 * r:(j1 + 1) * r]
        return carry

    # ---- stage 2: per j1, ONE deep-K matmul (bt, m2*r) @ (m2*r, n2) ---------
    def stage2_static(j1):
        y = jnp.dot(t_ref[j1], w2_ref[j1], preferred_element_type=jnp.float32)
        o_ref[:, j1 * n2:(j1 + 1) * n2] = y.astype(o_ref.dtype)

    def stage2_dyn(j1, carry):
        y = jnp.dot(t_ref[j1], w2_ref[j1], preferred_element_type=jnp.float32)
        start = pl.multiple_of(j1 * n2, n2)
        o_ref[:, pl.ds(start, n2)] = y.astype(o_ref.dtype)
        return carry

    if m2 <= unroll_threshold:
        for i2 in range(m2):
            stage1_static(i2)
    else:
        jax.lax.fori_loop(0, m2, stage1_dyn, 0, unroll=4)

    if n1 <= unroll_threshold:
        for j1 in range(n1):
            stage2_static(j1)
    else:
        jax.lax.fori_loop(0, n1, stage2_dyn, 0, unroll=4)


def btt_forward(x, W1, W2, shapes, *, block_b=None):
    """Pallas BTT forward.

    x  : (B, m1*m2)       input (dtype = output dtype; cast to W dtype in-kernel)
    W1 : (m2, m1, n1*r)   natural torch layout; dtype = MXU compute dtype
    W2 : (n1, m2*r, n2)   natural torch layout; dtype = MXU compute dtype
    """
    rs, ms, ns = shapes
    r = rs[1]
    m1, m2 = ms
    n1, n2 = ns
    B, d_in = x.shape
    assert d_in == m1 * m2
    d_out = n1 * n2
    out_dtype = x.dtype
    w_dtype = W1.dtype
    t_dtype = w_dtype

    # ---- generation-aware VMEM budget & batch tile --------------------------
    vmem_cap = _vmem_capacity_bytes()
    budget = int(vmem_cap * 0.8)
    fixed = (_padded_bytes((m2, m1, n1 * r), w_dtype)
             + _padded_bytes((n1, m2 * r, n2), w_dtype))     # resident weights
    per_row = (2 * _round_up(d_in, 128) * jnp.dtype(x.dtype).itemsize
               + 2 * _round_up(d_out, 128) * jnp.dtype(out_dtype).itemsize
               + n1 * _round_up(m2 * r, 128) * jnp.dtype(t_dtype).itemsize)
    bt = _pick_batch_tile(B, per_row, fixed, budget, requested=block_b)

    B_pad = _round_up(B, bt)
    if B_pad != B:
        x = jnp.pad(x, ((0, B_pad - B), (0, 0)))
    grid = (B_pad // bt,)

    est = (fixed
           + 2 * _padded_bytes((bt, d_in), x.dtype)
           + 2 * _padded_bytes((bt, d_out), out_dtype)
           + _padded_bytes((n1, bt, m2 * r), t_dtype))
    vmem_limit = int(min(max(2 * est, 32 * 1024 * 1024), int(vmem_cap * 0.9)))

    kernel = functools.partial(_btt_kernel, m1=m1, m2=m2, n1=n1, n2=n2, r=r,
                               unroll_threshold=64)

    def _run(single_buffer_weights):
        w_mode = {}
        if single_buffer_weights:
            # Weights have a constant index_map: double-buffering them only
            # wastes VMEM (matters most inside v7x's 64 MiB per core).
            w_mode = dict(pipeline_mode=pl.Buffered(1))
        in_specs = [
            pl.BlockSpec((bt, d_in), lambda b: (b, 0)),
            pl.BlockSpec((m2, m1, n1 * r), lambda b: (0, 0, 0), **w_mode),
            pl.BlockSpec((n1, m2 * r, n2), lambda b: (0, 0, 0), **w_mode),
        ]
        return pl.pallas_call(
            kernel,
            out_shape=jax.ShapeDtypeStruct((B_pad, d_out), out_dtype),
            grid_spec=pltpu.PrefetchScalarGridSpec(
                num_scalar_prefetch=0,
                grid=grid,
                in_specs=in_specs,
                out_specs=pl.BlockSpec((bt, d_out), lambda b: (b, 0)),
                scratch_shapes=[pltpu.VMEM((n1, bt, m2 * r), t_dtype)],
            ),
            compiler_params=pltpu.CompilerParams(
                dimension_semantics=("parallel",),
                vmem_limit_bytes=vmem_limit),
        )(x, W1, W2)

    try:
        out = _run(True)
    except Exception:
        # pl.Buffered(1) unsupported on this jax/libtpu combination: fall back
        # to default double-buffered weight blocks.
        out = _run(False)

    return out if B_pad == B else out[:B]


# ------------------------------ Layer wrapper ------------------------------ #

class BTTLayer:
    """JAX/Pallas port of the PyTorch BTTLayer (forward only).

    compute_dtype=jnp.bfloat16 is recommended on all TPU generations: bf16
    operands run the MXU at full rate and halve HBM traffic; accumulation
    stays f32 inside the kernel.
    """
    # TODO(synk): backward pass (custom autograd in the PyTorch reference) is
    # not implemented here; this is a forward-only port.

    def __init__(self, d_in, d_out, tt_rank, normalize=False, key=None,
                 compute_dtype=None, block_b=None):
        self.m1, self.m2 = closest_factors(d_in)
        self.n1, self.n2 = closest_factors(d_out)
        assert self.m1 * self.m2 == d_in
        assert self.n1 * self.n2 == d_out
        self.rs = (1, tt_rank, 1)
        self.ms = (self.m1, self.m2)
        self.ns = (self.n1, self.n2)
        self.shapes = (self.rs, self.ms, self.ns)
        self.normalize = normalize
        self.tt_rank = tt_rank
        self.block_b = block_b
        self.max_rms = (min(d_in, d_out) * d_out / (d_out * d_in * d_in)) ** 0.5

        key = jax.random.PRNGKey(42) if key is None else key
        k1, k2 = jax.random.split(key)

        # Deterministic xavier-normal-style init (same shapes / std recipe as
        # the PyTorch module; exact RNG draws obviously differ).
        w1_shape = (self.m2, self.m1 * self.rs[0], self.n1 * self.rs[1])
        w2_shape = (self.n1, self.m2 * self.rs[1], self.n2 * self.rs[2])
        gain1 = 1.0 / math.sqrt(self.m1 * self.rs[0])
        gain2 = 1.0 / math.sqrt(self.m2 * self.rs[1])
        fan_in1, fan_out1 = w1_shape[1] * w1_shape[2], w1_shape[0] * w1_shape[2]
        fan_in2, fan_out2 = w2_shape[1] * w2_shape[2], w2_shape[0] * w2_shape[2]
        std1 = gain1 * math.sqrt(2.0 / (fan_in1 + fan_out1))
        std2 = gain2 * math.sqrt(2.0 / (fan_in2 + fan_out2))
        self.W1 = std1 * jax.random.normal(k1, w1_shape, dtype=jnp.float32)
        self.W2 = std2 * jax.random.normal(k2, w2_shape, dtype=jnp.float32)

        # One-time compute-dtype copies (no per-call HBM cast pass).
        if compute_dtype is None:
            self._W1c, self._W2c = self.W1, self.W2
        else:
            self._W1c = self.W1.astype(compute_dtype)
            self._W2c = self.W2.astype(compute_dtype)

    def __call__(self, x):
        W1, W2 = self._W1c, self._W2c
        if self.normalize:
            rms_W0 = jnp.sqrt(jnp.mean(self.W1 ** 2.0) + 1e-08)
            rms_W1 = jnp.sqrt(jnp.mean(self.W2 ** 2.0) + 1e-08)
            W1 = (W1.astype(jnp.float32)
                  / jnp.maximum(1.0, rms_W0 / self.max_rms)).astype(W1.dtype)
            W2 = (W2.astype(jnp.float32)
                  / jnp.maximum(1.0, rms_W1 / self.max_rms)).astype(W2.dtype)
        return btt_forward(x, W1, W2, self.shapes, block_b=self.block_b)


# ------------------------ pure-JAX reference (check) ----------------------- #

def btt_reference(x, W1, W2, shapes):
    hi = jax.lax.Precision.HIGHEST
    rs, ms, ns = shapes
    r = rs[1]
    m1, m2 = ms
    n1, n2 = ns
    B = x.shape[0]
    y = x.reshape(B, m2, m1).transpose(1, 0, 2)                       # (m2, B, m1)
    out1 = jnp.einsum('cbi,cio->cbo', y, W1, precision=hi)            # (m2, B, n1*r)
    out1 = out1.reshape(m2, B, n1, r).transpose(2, 1, 0, 3)           # (n1, B, m2, r)
    out1 = out1.reshape(n1, B, m2 * r)
    out2 = jnp.einsum('jbk,jkn->jbn', out1, W2, precision=hi)         # (n1, B, n2)
    return out2.transpose(1, 0, 2).reshape(B, n1 * n2)


if __name__ == "__main__":
    key = jax.random.PRNGKey(0)
    kx, kw, kx2, kw2 = jax.random.split(key, 4)

    # ---- small config -------------------------------------------------------
    d_in, d_out, tt_rank, B = 32, 32, 2, 8
    x = jax.random.normal(kx, (B, d_in), dtype=jnp.float32)

    layer = BTTLayer(d_in, d_out, tt_rank, normalize=False, key=kw)
    out = jax.block_until_ready(layer(x))
    ref = btt_reference(x, layer.W1, layer.W2, layer.shapes)
    assert out.shape == (B, d_out)
    assert jnp.allclose(out, ref, rtol=5e-2, atol=5e-3), "f32 mismatch vs reference"

    # bf16-operand path (full-rate MXU on v5e/v6e/v7x), f32 accumulation.
    layer_bf16 = BTTLayer(d_in, d_out, tt_rank, normalize=False, key=kw,
                          compute_dtype=jnp.bfloat16)
    out_bf16 = jax.block_until_ready(layer_bf16(x))
    assert jnp.allclose(out_bf16, ref, rtol=5e-2, atol=2e-2), "bf16 mismatch vs reference"

    # normalize=True path.
    layer_n = BTTLayer(d_in, d_out, tt_rank, normalize=True, key=kw)
    out_n = jax.block_until_ready(layer_n(x))
    rms_W0 = jnp.sqrt(jnp.mean(layer_n.W1 ** 2.0) + 1e-08)
    rms_W1 = jnp.sqrt(jnp.mean(layer_n.W2 ** 2.0) + 1e-08)
    W1n = layer_n.W1 / jnp.maximum(1.0, rms_W0 / layer_n.max_rms)
    W2n = layer_n.W2 / jnp.maximum(1.0, rms_W1 / layer_n.max_rms)
    ref_n = btt_reference(x, W1n, W2n, layer_n.shapes)
    assert jnp.allclose(out_n, ref_n, rtol=5e-2, atol=5e-3), "normalize mismatch"

    # Ragged batch + multi-tile grid (exercises padding and >= 2 grid steps).
    d_in2, d_out2, r2, B2 = 128, 64, 4, 50
    x2 = jax.random.normal(kx2, (B2, d_in2), dtype=jnp.float32)
    layer2 = BTTLayer(d_in2, d_out2, r2, normalize=False, key=kw2)
    out2 = jax.block_until_ready(layer2(x2))
    ref2 = btt_reference(x2, layer2.W1, layer2.W2, layer2.shapes)
    assert out2.shape == (B2, d_out2)
    assert jnp.allclose(out2, ref2, rtol=5e-2, atol=5e-3), "multi-tile mismatch"

    print("KERNEL_OK")
</pallas_src>

<mosaic_0001>
module attributes {stable_mosaic.version = 11 : i64} {
  func.func @_btt_kernel(%arg0: i32, %arg1: memref<8x32xf32, #tpu.memory_space<vmem>>, %arg2: memref<4x8x16xf32, #tpu.memory_space<vmem>>, %arg3: memref<8x8x4xf32, #tpu.memory_space<vmem>>, %arg4: memref<8x32xf32, #tpu.memory_space<vmem>>, %arg5: memref<8x8x8xf32, #tpu.memory_space<vmem>>) attributes {dimension_semantics = [#tpu.dimension_semantics<parallel>], iteration_bounds = array<i64: 1>, scalar_prefetch = 0 : i64, scratch_operands = 1 : i64, tpu.core_type = #tpu.core_type<tc>, window_params = [{transform_indices = @transform_0, window_bounds = array<i64: 8, 32>}, {pipeline_mode = #tpu.pipeline_mode<synchronous>, transform_indices = @transform_1, window_bounds = array<i64: 4, 8, 16>}, {pipeline_mode = #tpu.pipeline_mode<synchronous>, transform_indices = @transform_2, window_bounds = array<i64: 8, 8, 4>}, {transform_indices = @transform_3, window_bounds = array<i64: 8, 32>}]} {
    %c0 = arith.constant 0 : index
    %c0_0 = arith.constant 0 : index
    %0 = vector.load %arg1[%c0, %c0_0] : memref<8x32xf32, #tpu.memory_space<vmem>>, vector<8x8xf32>
    %c0_1 = arith.constant 0 : index
    %c0_2 = arith.constant 0 : index
    %c0_3 = arith.constant 0 : index
    %1 = vector.load %arg2[%c0_1, %c0_2, %c0_3] : memref<4x8x16xf32, #tpu.memory_space<vmem>>, vector<1x8x16xf32>
    %2 = vector.shape_cast %1 : vector<1x8x16xf32> to vector<8x16xf32>
    %cst = arith.constant dense<0.000000e+00> : vector<8x16xf32>
    %3 = tpu.matmul %0, %2, %cst {dimension_numbers = #tpu.dot_dimension_numbers<[1], [0], [0], [1], [0, 0, 1, 1], [], []>} : vector<8x8xf32>, vector<8x16xf32>, vector<8x16xf32> -> vector<8x16xf32>
    %4 = vector.extract_strided_slice %3 {offsets = [0, 0], sizes = [8, 2], strides = [1, 1]} : vector<8x16xf32> to vector<8x2xf32>
    %c0_4 = arith.constant 0 : index
    %c0_5 = arith.constant 0 : index
    %c0_6 = arith.constant 0 : index
    %5 = vector.load %arg5[%c0_4, %c0_5, %c0_6] : memref<8x8x8xf32, #tpu.memory_space<vmem>>, vector<1x8x2xf32>
    %6 = vector.shape_cast %5 : vector<1x8x2xf32> to vector<8x2xf32>
    %7 = vector.shape_cast %4 : vector<8x2xf32> to vector<1x8x2xf32>
    tpu.vector_store %arg5[%c0_4, %c0_5, %c0_6], %7 {strides = array<i32>} : memref<8x8x8xf32, #tpu.memory_space<vmem>>, vector<1x8x2xf32>,
    %8 = vector.extract_strided_slice %3 {offsets = [0, 2], sizes = [8, 2], strides = [1, 1]} : vector<8x16xf32> to vector<8x2xf32>
    %c1 = arith.constant 1 : index
    %c0_7 = arith.constant 0 : index
    %c0_8 = arith.constant 0 : index
    %9 = vector.load %arg5[%c1, %c0_7, %c0_8] : memref<8x8x8xf32, #tpu.memory_space<vmem>>, vector<1x8x2xf32>
    %10 = vector.shape_cast %9 : vector<1x8x2xf32> to vector<8x2xf32>
    %11 = vector.shape_cast %8 : vector<8x2xf32> to vector<1x8x2xf32>
    tpu.vector_store %arg5[%c1, %c0_7, %c0_8], %11 {strides = array<i32>} : memref<8x8x8xf32, #tpu.memory_space<vmem>>, vector<1x8x2xf32>,
    %12 = vector.extract_strided_slice %3 {offsets = [0, 4], sizes = [8, 2], strides = [1, 1]} : vector<8x16xf32> to vector<8x2xf32>
    %c2 = arith.constant 2 : index
    %c0_9 = arith.constant 0 : index
    %c0_10 = arith.constant 0 : index
    %13 = vector.load %arg5[%c2, %c0_9, %c0_10] : memref<8x8x8xf32, #tpu.memory_space<vmem>>, vector<1x8x2xf32>
    %14 = vector.shape_cast %13 : vector<1x8x2xf32> to vector<8x2xf32>
    %15 = vector.shape_cast %12 : vector<8x2xf32> to vector<1x8x2xf32>
    tpu.vector_store %arg5[%c2, %c0_9, %c0_10], %15 {strides = array<i32>} : memref<8x8x8xf32, #tpu.memory_space<vmem>>, vector<1x8x2xf32>,
    %16 = vector.extract_strided_slice %3 {offsets = [0, 6], sizes = [8, 2], strides = [1, 1]} : vector<8x16xf32> to vector<8x2xf32>
    %c3 = arith.constant 3 : index
    %c0_11 = arith.constant 0 : index
    %c0_12 = arith.constant 0 : index
    %17 = vector.load %arg5[%c3, %c0_11, %c0_12] : memref<8x8x8xf32, #tpu.memory_space<vmem>>, vector<1x8x2xf32>
    %18 = vector.shape_cast %17 : vector<1x8x2xf32> to vector<8x2xf32>
    %19 = vector.shape_cast %16 : vector<8x2xf32> to vector<1x8x2xf32>
    tpu.vector_store %arg5[%c3, %c0_11, %c0_12], %19 {strides = array<i32>} : memref<8x8x8xf32, #tpu.memory_space<vmem>>, vector<1x8x2xf32>,
    %20 = vector.extract_strided_slice %3 {offsets = [0, 8], sizes = [8, 2], strides = [1, 1]} : vector<8x16xf32> to vector<8x2xf32>
    %c4 = arith.constant 4 : index
    %c0_13 = arith.constant 0 : index
    %c0_14 = arith.constant 0 : index
    %21 = vector.load %arg5[%c4, %c0_13, %c0_14] : memref<8x8x8xf32, #tpu.memory_space<vmem>>, vector<1x8x2xf32>
    %22 = vector.shape_cast %21 : vector<1x8x2xf32> to vector<8x2xf32>
    %23 = vector.shape_cast %20 : vector<8x2xf32> to vector<1x8x2xf32>
    tpu.vector_store %arg5[%c4, %c0_13, %c0_14], %23 {strides = array<i32>} : memref<8x8x8xf32, #tpu.memory_space<vmem>>, vector<1x8x2xf32>,
    %24 = vector.extract_strided_slice %3 {offsets = [0, 10], sizes = [8, 2], strides = [1, 1]} : vector<8x16xf32> to vector<8x2xf32>
    %c5 = arith.constant 5 : index
    %c0_15 = arith.constant 0 : index
    %c0_16 = arith.constant 0 : index
    %25 = vector.load %arg5[%c5, %c0_15, %c0_16] : memref<8x8x8xf32, #tpu.memory_space<vmem>>, vector<1x8x2xf32>
    %26 = vector.shape_cast %25 : vector<1x8x2xf32> to vector<8x2xf32>
    %27 = vector.shape_cast %24 : vector<8x2xf32> to vector<1x8x2xf32>
    tpu.vector_store %arg5[%c5, %c0_15, %c0_16], %27 {strides = array<i32>} : memref<8x8x8xf32, #tpu.memory_space<vmem>>, vector<1x8x2xf32>,
    %28 = vector.extract_strided_slice %3 {offsets = [0, 12], sizes = [8, 2], strides = [1, 1]} : vector<8x16xf32> to vector<8x2xf32>
    %c6 = arith.constant 6 : index
    %c0_17 = arith.constant 0 : index
    %c0_18 = arith.constant 0 : index
    %29 = vector.load %arg5[%c6, %c0_17, %c0_18] : memref<8x8x8xf32, #tpu.memory_space<vmem>>, vector<1x8x2xf32>
    %30 = vector.shape_cast %29 : vector<1x8x2xf32> to vector<8x2xf32>
    %31 = vector.shape_cast %28 : vector<8x2xf32> to vector<1x8x2xf32>
    tpu.vector_store %arg5[%c6, %c0_17, %c0_18], %31 {strides = array<i32>} : memref<8x8x8xf32, #tpu.memory_space<vmem>>, vector<1x8x2xf32>,
    %32 = vector.extract_strided_slice %3 {offsets = [0, 14], sizes = [8, 2], strides = [1, 1]} : vector<8x16xf32> to vector<8x2xf32>
    %c7 = arith.constant 7 : index
    %c0_19 = arith.constant 0 : index
    %c0_20 = arith.constant 0 : index
    %33 = vector.load %arg5[%c7, %c0_19, %c0_20] : memref<8x8x8xf32, #tpu.memory_space<vmem>>, vector<1x8x2xf32>
    %34 = vector.shape_cast %33 : vector<1x8x2xf32> to vector<8x2xf32>
    %35 = vector.shape_cast %32 : vector<8x2xf32> to vector<1x8x2xf32>
    tpu.vector_store %arg5[%c7, %c0_19, %c0_20], %35 {strides = array<i32>} : memref<8x8x8xf32, #tpu.memory_space<vmem>>, vector<1x8x2xf32>,
    %c0_21 = arith.constant 0 : index
    %c8 = arith.constant 8 : index
    %36 = vector.load %arg1[%c0_21, %c8] : memref<8x32xf32, #tpu.memory_space<vmem>>, vector<8x8xf32>
    %c1_22 = arith.constant 1 : index
    %c0_23 = arith.constant 0 : index
    %c0_24 = arith.constant 0 : index
    %37 = vector.load %arg2[%c1_22, %c0_23, %c0_24] : memref<4x8x16xf32, #tpu.memory_space<vmem>>, vector<1x8x16xf32>
    %38 = vector.shape_cast %37 : vector<1x8x16xf32> to vector<8x16xf32>
    %cst_25 = arith.constant dense<0.000000e+00> : vector<8x16xf32>
    %39 = tpu.matmul %36, %38, %cst_25 {dimension_numbers = #tpu.dot_dimension_numbers<[1], [0], [0], [1], [0, 0, 1, 1], [], []>} : vector<8x8xf32>, vector<8x16xf32>, vector<8x16xf32> -> vector<8x16xf32>
    %40 = vector.extract_strided_slice %39 {offsets = [0, 0], sizes = [8, 2], strides = [1, 1]} : vector<8x16xf32> to vector<8x2xf32>
    %c0_26 = arith.constant 0 : index
    %c0_27 = arith.constant 0 : index
    %c2_28 = arith.constant 2 : index
    %41 = vector.load %arg5[%c0_26, %c0_27, %c2_28] : memref<8x8x8xf32, #tpu.memory_space<vmem>>, vector<1x8x2xf32>
    %42 = vector.shape_cast %41 : vector<1x8x2xf32> to vector<8x2xf32>
    %43 = vector.shape_cast %40 : vector<8x2xf32> to vector<1x8x2xf32>
    tpu.vector_store %arg5[%c0_26, %c0_27, %c2_28], %43 {strides = array<i32>} : memref<8x8x8xf32, #tpu.memory_space<vmem>>, vector<1x8x2xf32>,
    %44 = vector.extract_strided_slice %39 {offsets = [0, 2], sizes = [8, 2], strides = [1, 1]} : vector<8x16xf32> to vector<8x2xf32>
    %c1_29 = arith.constant 1 : index
    %c0_30 = arith.constant 0 : index
    %c2_31 = arith.constant 2 : index
    %45 = vector.load %arg5[%c1_29, %c0_30, %c2_31] : memref<8x8x8xf32, #tpu.memory_space<vmem>>, vector<1x8x2xf32>
    %46 = vector.shape_cast %45 : vector<1x8x2xf32> to vector<8x2xf32>
    %47 = vector.shape_cast %44 : vector<8x2xf32> to vector<1x8x2xf32>
    tpu.vector_store %arg5[%c1_29, %c0_30, %c2_31], %47 {strides = array<i32>} : memref<8x8x8xf32, #tpu.memory_space<vmem>>, vector<1x8x2xf32>,
    %48 = vector.extract_strided_slice %39 {offsets = [0, 4], sizes = [8, 2], strides = [1, 1]} : vector<8x16xf32> to vector<8x2xf32>
    %c2_32 = arith.constant 2 : index
    %c0_33 = arith.constant 0 : index
    %c2_34 = arith.constant 2 : index
    %49 = vector.load %arg5[%c2_32, %c0_33, %c2_34] : memref<8x8x8xf32, #tpu.memory_space<vmem>>, vector<1x8x2xf32>
    %50 = vector.shape_cast %49 : vector<1x8x2xf32> to vector<8x2xf32>
    %51 = vector.shape_cast %48 : vector<8x2xf32> to vector<1x8x2xf32>
    tpu.vector_store %arg5[%c2_32, %c0_33, %c2_34], %51 {strides = array<i32>} : memref<8x8x8xf32, #tpu.memory_space<vmem>>, vector<1x8x2xf32>,
    %52 = vector.extract_strided_slice %39 {offsets = [0, 6], sizes = [8, 2], strides = [1, 1]} : vector<8x16xf32> to vector<8x2xf32>
    %c3_35 = arith.constant 3 : index
    %c0_36 = arith.constant 0 : index
    %c2_37 = arith.constant 2 : index
    %53 = vector.load %arg5[%c3_35, %c0_36, %c2_37] : memref<8x8x8xf32, #tpu.memory_space<vmem>>, vector<1x8x2xf32>
    %54 = vector.shape_cast %53 : vector<1x8x2xf32> to vector<8x2xf32>
    %55 = vector.shape_cast %52 : vector<8x2xf32> to vector<1x8x2xf32>
    tpu.vector_store %arg5[%c3_35, %c0_36, %c2_37], %55 {strides = array<i32>} : memref<8x8x8xf32, #tpu.memory_space<vmem>>, vector<1x8x2xf32>,
    %56 = vector.extract_strided_slice %39 {offsets = [0, 8], sizes = [8, 2], strides = [1, 1]} : vector<8x16xf32> to vector<8x2xf32>
    %c4_38 = arith.constant 4 : index
    %c0_39 = arith.constant 0 : index
    %c2_40 = arith.constant 2 : index
    %57 = vector.load %arg5[%c4_38, %c0_39, %c2_40] : memref<8x8x8xf32, #tpu.memory_space<vmem>>, vector<1x8x2xf32>
    %58 = vector.shape_cast %57 : vector<1x8x2xf32> to vector<8x2xf32>
    %59 = vector.shape_cast %56 : vector<8x2xf32> to vector<1x8x2xf32>
    tpu.vector_store %arg5[%c4_38, %c0_39, %c2_40], %59 {strides = array<i32>} : memref<8x8x8xf32, #tpu.memory_space<vmem>>, vector<1x8x2xf32>,
    %60 = vector.extract_strided_slice %39 {offsets = [0, 10], sizes = [8, 2], strides = [1, 1]} : vector<8x16xf32> to vector<8x2xf32>
    %c5_41 = arith.constant 5 : index
    %c0_42 = arith.constant 0 : index
    %c2_43 = arith.constant 2 : index
    %61 = vector.load %arg5[%c5_41, %c0_42, %c2_43] : memref<8x8x8xf32, #tpu.memory_space<vmem>>, vector<1x8x2xf32>
    %62 = vector.shape_cast %61 : vector<1x8x2xf32> to vector<8x2xf32>
    %63 = vector.shape_cast %60 : vector<8x2xf32> to vector<1x8x2xf32>
    tpu.vector_store %arg5[%c5_41, %c0_42, %c2_43], %63 {strides = array<i32>} : memref<8x8x8xf32, #tpu.memory_space<vmem>>, vector<1x8x2xf32>,
    %64 = vector.extract_strided_slice %39 {offsets = [0, 12], sizes = [8, 2], strides = [1, 1]} : vector<8x16xf32> to vector<8x2xf32>
    %c6_44 = arith.constant 6 : index
    %c0_45 = arith.constant 0 : index
    %c2_46 = arith.constant 2 : index
    %65 = vector.load %arg5[%c6_44, %c0_45, %c2_46] : memref<8x8x8xf32, #tpu.memory_space<vmem>>, vector<1x8x2xf32>
    %66 = vector.shape_cast %65 : vector<1x8x2xf32> to vector<8x2xf32>
    %67 = vector.shape_cast %64 : vector<8x2xf32> to vector<1x8x2xf32>
    tpu.vector_store %arg5[%c6_44, %c0_45, %c2_46], %67 {strides = array<i32>} : memref<8x8x8xf32, #tpu.memory_space<vmem>>, vector<1x8x2xf32>,
    %68 = vector.extract_strided_slice %39 {offsets = [0, 14], sizes = [8, 2], strides = [1, 1]} : vector<8x16xf32> to vector<8x2xf32>
    %c7_47 = arith.constant 7 : index
    %c0_48 = arith.constant 0 : index
    %c2_49 = arith.constant 2 : index
    %69 = vector.load %arg5[%c7_47, %c0_48, %c2_49] : memref<8x8x8xf32, #tpu.memory_space<vmem>>, vector<1x8x2xf32>
    %70 = vector.shape_cast %69 : vector<1x8x2xf32> to vector<8x2xf32>
    %71 = vector.shape_cast %68 : vector<8x2xf32> to vector<1x8x2xf32>
    tpu.vector_store %arg5[%c7_47, %c0_48, %c2_49], %71 {strides = array<i32>} : memref<8x8x8xf32, #tpu.memory_space<vmem>>, vector<1x8x2xf32>,
    %c0_50 = arith.constant 0 : index
    %c16 = arith.constant 16 : index
    %72 = vector.load %arg1[%c0_50, %c16] : memref<8x32xf32, #tpu.memory_space<vmem>>, vector<8x8xf32>
    %c2_51 = arith.constant 2 : index
    %c0_52 = arith.constant 0 : index
    %c0_53 = arith.constant 0 : index
    %73 = vector.load %arg2[%c2_51, %c0_52, %c0_53] : memref<4x8x16xf32, #tpu.memory_space<vmem>>, vector<1x8x16xf32>
    %74 = vector.shape_cast %73 : vector<1x8x16xf32> to vector<8x16xf32>
    %cst_54 = arith.constant dense<0.000000e+00> : vector<8x16xf32>
    %75 = tpu.matmul %72, %74, %cst_54 {dimension_numbers = #tpu.dot_dimension_numbers<[1], [0], [0], [1], [0, 0, 1, 1], [], []>} : vector<8x8xf32>, vector<8x16xf32>, vector<8x16xf32> -> vector<8x16xf32>
    %76 = vector.extract_strided_slice %75 {offsets = [0, 0], sizes = [8, 2], strides = [1, 1]} : vector<8x16xf32> to vector<8x2xf32>
    %c0_55 = arith.constant 0 : index
    %c0_56 = arith.constant 0 : index
    %c4_57 = arith.constant 4 : index
    %77 = vector.load %arg5[%c0_55, %c0_56, %c4_57] : memref<8x8x8xf32, #tpu.memory_space<vmem>>, vector<1x8x2xf32>
    %78 = vector.shape_cast %77 : vector<1x8x2xf32> to vector<8x2xf32>
    %79 = vector.shape_cast %76 : vector<8x2xf32> to vector<1x8x2xf32>
    tpu.vector_store %arg5[%c0_55, %c0_56, %c4_57], %79 {strides = array<i32>} : memref<8x8x8xf32, #tpu.memory_space<vmem>>, vector<1x8x2xf32>,
    %80 = vector.extract_strided_slice %75 {offsets = [0, 2], sizes = [8, 2], strides = [1, 1]} : vector<8x16xf32> to vector<8x2xf32>
    %c1_58 = arith.constant 1 : index
    %c0_59 = arith.constant 0 : index
    %c4_60 = arith.constant 4 : index
    %81 = vector.load %arg5[%c1_58, %c0_59, %c4_60] : memref<8x8x8xf32, #tpu.memory_space<vmem>>, vector<1x8x2xf32>
    %82 = vector.shape_cast %81 : vector<1x8x2xf32> to vector<8x2xf32>
    %83 = vector.shape_cast %80 : vector<8x2xf32> to vector<1x8x2xf32>
    tpu.vector_store %arg5[%c1_58, %c0_59, %c4_60], %83 {strides = array<i32>} : memref<8x8x8xf32, #tpu.memory_space<vmem>>, vector<1x8x2xf32>,
    %84 = vector.extract_strided_slice %75 {offsets = [0, 4], sizes = [8, 2], strides = [1, 1]} : vector<8x16xf32> to vector<8x2xf32>
    %c2_61 = arith.constant 2 : index
    %c0_62 = arith.constant 0 : index
    %c4_63 = arith.constant 4 : index
    %85 = vector.load %arg5[%c2_61, %c0_62, %c4_63] : memref<8x8x8xf32, #tpu.memory_space<vmem>>, vector<1x8x2xf32>
    %86 = vector.shape_cast %85 : vector<1x8x2xf32> to vector<8x2xf32>
    %87 = vector.shape_cast %84 : vector<8x2xf32> to vector<1x8x2xf32>
    tpu.vector_store %arg5[%c2_61, %c0_62, %c4_63], %87 {strides = array<i32>} : memref<8x8x8xf32, #tpu.memory_space<vmem>>, vector<1x8x2xf32>,
    %88 = vector.extract_strided_slice %75 {offsets = [0, 6], sizes = [8, 2], strides = [1, 1]} : vector<8x16xf32> to vector<8x2xf32>
    %c3_64 = arith.constant 3 : index
    %c0_65 = arith.constant 0 : index
    %c4_66 = arith.constant 4 : index
    %89 = vector.load %arg5[%c3_64, %c0_65, %c4_66] : memref<8x8x8xf32, #tpu.memory_space<vmem>>, vector<1x8x2xf32>
    %90 = vector.shape_cast %89 : vector<1x8x2xf32> to vector<8x2xf32>
    %91 = vector.shape_cast %88 : vector<8x2xf32> to vector<1x8x2xf32>
    tpu.vector_store %arg5[%c3_64, %c0_65, %c4_66], %91 {strides = array<i32>} : memref<8x8x8xf32, #tpu.memory_space<vmem>>, vector<1x8x2xf32>,
    %92 = vector.extract_strided_slice %75 {offsets = [0, 8], sizes = [8, 2], strides = [1, 1]} : vector<8x16xf32> to vector<8x2xf32>
    %c4_67 = arith.constant 4 : index
    %c0_68 = arith.constant 0 : index
    %c4_69 = arith.constant 4 : index
    %93 = vector.load %arg5[%c4_67, %c0_68, %c4_69] : memref<8x8x8xf32, #tpu.memory_space<vmem>>, vector<1x8x2xf32>
    %94 = vector.shape_cast %93 : vector<1x8x2xf32> to vector<8x2xf32>
    %95 = vector.shape_cast %92 : vector<8x2xf32> to vector<1x8x2xf32>
    tpu.vector_store %arg5[%c4_67, %c0_68, %c4_69], %95 {strides = array<i32>} : memref<8x8x8xf32, #tpu.memory_space<vmem>>, vector<1x8x2xf32>,
    %96 = vector.extract_strided_slice %75 {offsets = [0, 10], sizes = [8, 2], strides = [1, 1]} : vector<8x16xf32> to vector<8x2xf32>
    %c5_70 = arith.constant 5 : index
    %c0_71 = arith.constant 0 : index
    %c4_72 = arith.constant 4 : index
    %97 = vector.load %arg5[%c5_70, %c0_71, %c4_72] : memref<8x8x8xf32, #tpu.memory_space<vmem>>, vector<1x8x2xf32>
    %98 = vector.shape_cast %97 : vector<1x8x2xf32> to vector<8x2xf32>
    %99 = vector.shape_cast %96 : vector<8x2xf32> to vector<1x8x2xf32>
    tpu.vector_store %arg5[%c5_70, %c0_71, %c4_72], %99 {strides = array<i32>} : memref<8x8x8xf32, #tpu.memory_space<vmem>>, vector<1x8x2xf32>,
    %100 = vector.extract_strided_slice %75 {offsets = [0, 12], sizes = [8, 2], strides = [1, 1]} : vector<8x16xf32> to vector<8x2xf32>
    %c6_73 = arith.constant 6 : index
    %c0_74 = arith.constant 0 : index
    %c4_75 = arith.constant 4 : index
    %101 = vector.load %arg5[%c6_73, %c0_74, %c4_75] : memref<8x8x8xf32, #tpu.memory_space<vmem>>, vector<1x8x2xf32>
    %102 = vector.shape_cast %101 : vector<1x8x2xf32> to vector<8x2xf32>
    %103 = vector.shape_cast %100 : vector<8x2xf32> to vector<1x8x2xf32>
    tpu.vector_store %arg5[%c6_73, %c0_74, %c4_75], %103 {strides = array<i32>} : memref<8x8x8xf32, #tpu.memory_space<vmem>>, vector<1x8x2xf32>,
    %104 = vector.extract_strided_slice %75 {offsets = [0, 14], sizes = [8, 2], strides = [1, 1]} : vector<8x16xf32> to vector<8x2xf32>
    %c7_76 = arith.constant 7 : index
    %c0_77 = arith.constant 0 : index
    %c4_78 = arith.constant 4 : index
    %105 = vector.load %arg5[%c7_76, %c0_77, %c4_78] : memref<8x8x8xf32, #tpu.memory_space<vmem>>, vector<1x8x2xf32>
    %106 = vector.shape_cast %105 : vector<1x8x2xf32> to vector<8x2xf32>
    %107 = vector.shape_cast %104 : vector<8x2xf32> to vector<1x8x2xf32>
    tpu.vector_store %arg5[%c7_76, %c0_77, %c4_78], %107 {strides = array<i32>} : memref<8x8x8xf32, #tpu.memory_space<vmem>>, vector<1x8x2xf32>,
    %c0_79 = arith.constant 0 : index
    %c24 = arith.constant 24 : index
    %108 = vector.load %arg1[%c0_79, %c24] : memref<8x32xf32, #tpu.memory_space<vmem>>, vector<8x8xf32>
    %c3_80 = arith.constant 3 : index
    %c0_81 = arith.constant 0 : index
    %c0_82 = arith.constant 0 : index
    %109 = vector.load %arg2[%c3_80, %c0_81, %c0_82] : memref<4x8x16xf32, #tpu.memory_space<vmem>>, vector<1x8x16xf32>
    %110 = vector.shape_cast %109 : vector<1x8x16xf32> to vector<8x16xf32>
    %cst_83 = arith.constant dense<0.000000e+00> : vector<8x16xf32>
    %111 = tpu.matmul %108, %110, %cst_83 {dimension_numbers = #tpu.dot_dimension_numbers<[1], [0], [0], [1], [0, 0, 1, 1], [], []>} : vector<8x8xf32>, vector<8x16xf32>, vector<8x16xf32> -> vector<8x16xf32>
    %112 = vector.extract_strided_slice %111 {offsets = [0, 0], sizes = [8, 2], strides = [1, 1]} : vector<8x16xf32> to vector<8x2xf32>
    %c0_84 = arith.constant 0 : index
    %c0_85 = arith.constant 0 : index
    %c6_86 = arith.constant 6 : index
    %113 = vector.load %arg5[%c0_84, %c0_85, %c6_86] : memref<8x8x8xf32, #tpu.memory_space<vmem>>, vector<1x8x2xf32>
    %114 = vector.shape_cast %113 : vector<1x8x2xf32> to vector<8x2xf32>
    %115 = vector.shape_cast %112 : vector<8x2xf32> to vector<1x8x2xf32>
    tpu.vector_store %arg5[%c0_84, %c0_85, %c6_86], %115 {strides = array<i32>} : memref<8x8x8xf32, #tpu.memory_space<vmem>>, vector<1x8x2xf32>,
    %116 = vector.extract_strided_slice %111 {offsets = [0, 2], sizes = [8, 2], strides = [1, 1]} : vector<8x16xf32> to vector<8x2xf32>
    %c1_87 = arith.constant 1 : index
    %c0_88 = arith.constant 0 : index
    %c6_89 = arith.constant 6 : index
    %117 = vector.load %arg5[%c1_87, %c0_88, %c6_89] : memref<8x8x8xf32, #tpu.memory_space<vmem>>, vector<1x8x2xf32>
    %118 = vector.shape_cast %117 : vector<1x8x2xf32> to vector<8x2xf32>
    %119 = vector.shape_cast %116 : vector<8x2xf32> to vector<1x8x2xf32>
    tpu.vector_store %arg5[%c1_87, %c0_88, %c6_89], %119 {strides = array<i32>} : memref<8x8x8xf32, #tpu.memory_space<vmem>>, vector<1x8x2xf32>,
    %120 = vector.extract_strided_slice %111 {offsets = [0, 4], sizes = [8, 2], strides = [1, 1]} : vector<8x16xf32> to vector<8x2xf32>
    %c2_90 = arith.constant 2 : index
    %c0_91 = arith.constant 0 : index
    %c6_92 = arith.constant 6 : index
    %121 = vector.load %arg5[%c2_90, %c0_91, %c6_92] : memref<8x8x8xf32, #tpu.memory_space<vmem>>, vector<1x8x2xf32>
    %122 = vector.shape_cast %121 : vector<1x8x2xf32> to vector<8x2xf32>
    %123 = vector.shape_cast %120 : vector<8x2xf32> to vector<1x8x2xf32>
    tpu.vector_store %arg5[%c2_90, %c0_91, %c6_92], %123 {strides = array<i32>} : memref<8x8x8xf32, #tpu.memory_space<vmem>>, vector<1x8x2xf32>,
    %124 = vector.extract_strided_slice %111 {offsets = [0, 6], sizes = [8, 2], strides = [1, 1]} : vector<8x16xf32> to vector<8x2xf32>
    %c3_93 = arith.constant 3 : index
    %c0_94 = arith.constant 0 : index
    %c6_95 = arith.constant 6 : index
    %125 = vector.load %arg5[%c3_93, %c0_94, %c6_95] : memref<8x8x8xf32, #tpu.memory_space<vmem>>, vector<1x8x2xf32>
    %126 = vector.shape_cast %125 : vector<1x8x2xf32> to vector<8x2xf32>
    %127 = vector.shape_cast %124 : vector<8x2xf32> to vector<1x8x2xf32>
    tpu.vector_store %arg5[%c3_93, %c0_94, %c6_95], %127 {strides = array<i32>} : memref<8x8x8xf32, #tpu.memory_space<vmem>>, vector<1x8x2xf32>,
    %128 = vector.extract_strided_slice %111 {offsets = [0, 8], sizes = [8, 2], strides = [1, 1]} : vector<8x16xf32> to vector<8x2xf32>
    %c4_96 = arith.constant 4 : index
    %c0_97 = arith.constant 0 : index
    %c6_98 = arith.constant 6 : index
    %129 = vector.load %arg5[%c4_96, %c0_97, %c6_98] : memref<8x8x8xf32, #tpu.memory_space<vmem>>, vector<1x8x2xf32>
    %130 = vector.shape_cast %129 : vector<1x8x2xf32> to vector<8x2xf32>
    %131 = vector.shape_cast %128 : vector<8x2xf32> to vector<1x8x2xf32>
    tpu.vector_store %arg5[%c4_96, %c0_97, %c6_98], %131 {strides = array<i32>} : memref<8x8x8xf32, #tpu.memory_space<vmem>>, vector<1x8x2xf32>,
    %132 = vector.extract_strided_slice %111 {offsets = [0, 10], sizes = [8, 2], strides = [1, 1]} : vector<8x16xf32> to vector<8x2xf32>
    %c5_99 = arith.constant 5 : index
    %c0_100 = arith.constant 0 : index
    %c6_101 = arith.constant 6 : index
    %133 = vector.load %arg5[%c5_99, %c0_100, %c6_101] : memref<8x8x8xf32, #tpu.memory_space<vmem>>, vector<1x8x2xf32>
    %134 = vector.shape_cast %133 : vector<1x8x2xf32> to vector<8x2xf32>
    %135 = vector.shape_cast %132 : vector<8x2xf32> to vector<1x8x2xf32>
    tpu.vector_store %arg5[%c5_99, %c0_100, %c6_101], %135 {strides = array<i32>} : memref<8x8x8xf32, #tpu.memory_space<vmem>>, vector<1x8x2xf32>,
    %136 = vector.extract_strided_slice %111 {offsets = [0, 12], sizes = [8, 2], strides = [1, 1]} : vector<8x16xf32> to vector<8x2xf32>
    %c6_102 = arith.constant 6 : index
    %c0_103 = arith.constant 0 : index
    %c6_104 = arith.constant 6 : index
    %137 = vector.load %arg5[%c6_102, %c0_103, %c6_104] : memref<8x8x8xf32, #tpu.memory_space<vmem>>, vector<1x8x2xf32>
    %138 = vector.shape_cast %137 : vector<1x8x2xf32> to vector<8x2xf32>
    %139 = vector.shape_cast %136 : vector<8x2xf32> to vector<1x8x2xf32>
    tpu.vector_store %arg5[%c6_102, %c0_103, %c6_104], %139 {strides = array<i32>} : memref<8x8x8xf32, #tpu.memory_space<vmem>>, vector<1x8x2xf32>,
    %140 = vector.extract_strided_slice %111 {offsets = [0, 14], sizes = [8, 2], strides = [1, 1]} : vector<8x16xf32> to vector<8x2xf32>
    %c7_105 = arith.constant 7 : index
    %c0_106 = arith.constant 0 : index
    %c6_107 = arith.constant 6 : index
    %141 = vector.load %arg5[%c7_105, %c0_106, %c6_107] : memref<8x8x8xf32, #tpu.memory_space<vmem>>, vector<1x8x2xf32>
    %142 = vector.shape_cast %141 : vector<1x8x2xf32> to vector<8x2xf32>
    %143 = vector.shape_cast %140 : vector<8x2xf32> to vector<1x8x2xf32>
    tpu.vector_store %arg5[%c7_105, %c0_106, %c6_107], %143 {strides = array<i32>} : memref<8x8x8xf32, #tpu.memory_space<vmem>>, vector<1x8x2xf32>,
    %c0_108 = arith.constant 0 : index
    %c0_109 = arith.constant 0 : index
    %c0_110 = arith.constant 0 : index
    %144 = vector.load %arg5[%c0_108, %c0_109, %c0_110] : memref<8x8x8xf32, #tpu.memory_space<vmem>>, vector<1x8x8xf32>
    %145 = vector.shape_cast %144 : vector<1x8x8xf32> to vector<8x8xf32>
    %c0_111 = arith.constant 0 : index
    %c0_112 = arith.constant 0 : index
    %c0_113 = arith.constant 0 : index
    %146 = vector.load %arg3[%c0_111, %c0_112, %c0_113] : memref<8x8x4xf32, #tpu.memory_space<vmem>>, vector<1x8x4xf32>
    %147 = vector.shape_cast %146 : vector<1x8x4xf32> to vector<8x4xf32>
    %cst_114 = arith.constant dense<0.000000e+00> : vector<8x4xf32>
    %148 = tpu.matmul %145, %147, %cst_114 {dimension_numbers = #tpu.dot_dimension_numbers<[1], [0], [0], [1], [0, 0, 1, 1], [], []>} : vector<8x8xf32>, vector<8x4xf32>, vector<8x4xf32> -> vector<8x4xf32>
    %c0_115 = arith.constant 0 : index
    %c0_116 = arith.constant 0 : index
    %149 = vector.load %arg4[%c0_115, %c0_116] : memref<8x32xf32, #tpu.memory_space<vmem>>, vector<8x4xf32>
    tpu.vector_store %arg4[%c0_115, %c0_116], %148 {strides = array<i32>} : memref<8x32xf32, #tpu.memory_space<vmem>>, vector<8x4xf32>,
    %c1_117 = arith.constant 1 : index
    %c0_118 = arith.constant 0 : index
    %c0_119 = arith.constant 0 : index
    %150 = vector.load %arg5[%c1_117, %c0_118, %c0_119] : memref<8x8x8xf32, #tpu.memory_space<vmem>>, vector<1x8x8xf32>
    %151 = vector.shape_cast %150 : vector<1x8x8xf32> to vector<8x8xf32>
    %c1_120 = arith.constant 1 : index
    %c0_121 = arith.constant 0 : index
    %c0_122 = arith.constant 0 : index
    %152 = vector.load %arg3[%c1_120, %c0_121, %c0_122] : memref<8x8x4xf32, #tpu.memory_space<vmem>>, vector<1x8x4xf32>
    %153 = vector.shape_cast %152 : vector<1x8x4xf32> to vector<8x4xf32>
    %cst_123 = arith.constant dense<0.000000e+00> : vector<8x4xf32>
    %154 = tpu.matmul %151, %153, %cst_123 {dimension_numbers = #tpu.dot_dimension_numbers<[1], [0], [0], [1], [0, 0, 1, 1], [], []>} : vector<8x8xf32>, vector<8x4xf32>, vector<8x4xf32> -> vector<8x4xf32>
    %c0_124 = arith.constant 0 : index
    %c4_125 = arith.constant 4 : index
    %155 = vector.load %arg4[%c0_124, %c4_125] : memref<8x32xf32, #tpu.memory_space<vmem>>, vector<8x4xf32>
    tpu.vector_store %arg4[%c0_124, %c4_125], %154 {strides = array<i32>} : memref<8x32xf32, #tpu.memory_space<vmem>>, vector<8x4xf32>,
    %c2_126 = arith.constant 2 : index
    %c0_127 = arith.constant 0 : index
    %c0_128 = arith.constant 0 : index
    %156 = vector.load %arg5[%c2_126, %c0_127, %c0_128] : memref<8x8x8xf32, #tpu.memory_space<vmem>>, vector<1x8x8xf32>
    %157 = vector.shape_cast %156 : vector<1x8x8xf32> to vector<8x8xf32>
    %c2_129 = arith.constant 2 : index
    %c0_130 = arith.constant 0 : index
    %c0_131 = arith.constant 0 : index
    %158 = vector.load %arg3[%c2_129, %c0_130, %c0_131] : memref<8x8x4xf32, #tpu.memory_space<vmem>>, vector<1x8x4xf32>
    %159 = vector.shape_cast %158 : vector<1x8x4xf32> to vector<8x4xf32>
    %cst_132 = arith.constant dense<0.000000e+00> : vector<8x4xf32>
    %160 = tpu.matmul %157, %159, %cst_132 {dimension_numbers = #tpu.dot_dimension_numbers<[1], [0], [0], [1], [0, 0, 1, 1], [], []>} : vector<8x8xf32>, vector<8x4xf32>, vector<8x4xf32> -> vector<8x4xf32>
    %c0_133 = arith.constant 0 : index
    %c8_134 = arith.constant 8 : index
    %161 = vector.load %arg4[%c0_133, %c8_134] : memref<8x32xf32, #tpu.memory_space<vmem>>, vector<8x4xf32>
    tpu.vector_store %arg4[%c0_133, %c8_134], %160 {strides = array<i32>} : memref<8x32xf32, #tpu.memory_space<vmem>>, vector<8x4xf32>,
    %c3_135 = arith.constant 3 : index
    %c0_136 = arith.constant 0 : index
    %c0_137 = arith.constant 0 : index
    %162 = vector.load %arg5[%c3_135, %c0_136, %c0_137] : memref<8x8x8xf32, #tpu.memory_space<vmem>>, vector<1x8x8xf32>
    %163 = vector.shape_cast %162 : vector<1x8x8xf32> to vector<8x8xf32>
    %c3_138 = arith.constant 3 : index
    %c0_139 = arith.constant 0 : index
    %c0_140 = arith.constant 0 : index
    %164 = vector.load %arg3[%c3_138, %c0_139, %c0_140] : memref<8x8x4xf32, #tpu.memory_space<vmem>>, vector<1x8x4xf32>
    %165 = vector.shape_cast %164 : vector<1x8x4xf32> to vector<8x4xf32>
    %cst_141 = arith.constant dense<0.000000e+00> : vector<8x4xf32>
    %166 = tpu.matmul %163, %165, %cst_141 {dimension_numbers = #tpu.dot_dimension_numbers<[1], [0], [0], [1], [0, 0, 1, 1], [], []>} : vector<8x8xf32>, vector<8x4xf32>, vector<8x4xf32> -> vector<8x4xf32>
    %c0_142 = arith.constant 0 : index
    %c12 = arith.constant 12 : index
    %167 = vector.load %arg4[%c0_142, %c12] : memref<8x32xf32, #tpu.memory_space<vmem>>, vector<8x4xf32>
    tpu.vector_store %arg4[%c0_142, %c12], %166 {strides = array<i32>} : memref<8x32xf32, #tpu.memory_space<vmem>>, vector<8x4xf32>,
    %c4_143 = arith.constant 4 : index
    %c0_144 = arith.constant 0 : index
    %c0_145 = arith.constant 0 : index
    %168 = vector.load %arg5[%c4_143, %c0_144, %c0_145] : memref<8x8x8xf32, #tpu.memory_space<vmem>>, vector<1x8x8xf32>
    %169 = vector.shape_cast %168 : vector<1x8x8xf32> to vector<8x8xf32>
    %c4_146 = arith.constant 4 : index
    %c0_147 = arith.constant 0 : index
    %c0_148 = arith.constant 0 : index
    %170 = vector.load %arg3[%c4_146, %c0_147, %c0_148] : memref<8x8x4xf32, #tpu.memory_space<vmem>>, vector<1x8x4xf32>
    %171 = vector.shape_cast %170 : vector<1x8x4xf32> to vector<8x4xf32>
    %cst_149 = arith.constant dense<0.000000e+00> : vector<8x4xf32>
    %172 = tpu.matmul %169, %171, %cst_149 {dimension_numbers = #tpu.dot_dimension_numbers<[1], [0], [0], [1], [0, 0, 1, 1], [], []>} : vector<8x8xf32>, vector<8x4xf32>, vector<8x4xf32> -> vector<8x4xf32>
    %c0_150 = arith.constant 0 : index
    %c16_151 = arith.constant 16 : index
    %173 = vector.load %arg4[%c0_150, %c16_151] : memref<8x32xf32, #tpu.memory_space<vmem>>, vector<8x4xf32>
    tpu.vector_store %arg4[%c0_150, %c16_151], %172 {strides = array<i32>} : memref<8x32xf32, #tpu.memory_space<vmem>>, vector<8x4xf32>,
    %c5_152 = arith.constant 5 : index
    %c0_153 = arith.constant 0 : index
    %c0_154 = arith.constant 0 : index
    %174 = vector.load %arg5[%c5_152, %c0_153, %c0_154] : memref<8x8x8xf32, #tpu.memory_space<vmem>>, vector<1x8x8xf32>
    %175 = vector.shape_cast %174 : vector<1x8x8xf32> to vector<8x8xf32>
    %c5_155 = arith.constant 5 : index
    %c0_156 = arith.constant 0 : index
    %c0_157 = arith.constant 0 : index
    %176 = vector.load %arg3[%c5_155, %c0_156, %c0_157] : memref<8x8x4xf32, #tpu.memory_space<vmem>>, vector<1x8x4xf32>
    %177 = vector.shape_cast %176 : vector<1x8x4xf32> to vector<8x4xf32>
    %cst_158 = arith.constant dense<0.000000e+00> : vector<8x4xf32>
    %178 = tpu.matmul %175, %177, %cst_158 {dimension_numbers = #tpu.dot_dimension_numbers<[1], [0], [0], [1], [0, 0, 1, 1], [], []>} : vector<8x8xf32>, vector<8x4xf32>, vector<8x4xf32> -> vector<8x4xf32>
    %c0_159 = arith.constant 0 : index
    %c20 = arith.constant 20 : index
    %179 = vector.load %arg4[%c0_159, %c20] : memref<8x32xf32, #tpu.memory_space<vmem>>, vector<8x4xf32>
    tpu.vector_store %arg4[%c0_159, %c20], %178 {strides = array<i32>} : memref<8x32xf32, #tpu.memory_space<vmem>>, vector<8x4xf32>,
    %c6_160 = arith.constant 6 : index
    %c0_161 = arith.constant 0 : index
    %c0_162 = arith.constant 0 : index
    %180 = vector.load %arg5[%c6_160, %c0_161, %c0_162] : memref<8x8x8xf32, #tpu.memory_space<vmem>>, vector<1x8x8xf32>
    %181 = vector.shape_cast %180 : vector<1x8x8xf32> to vector<8x8xf32>
    %c6_163 = arith.constant 6 : index
    %c0_164 = arith.constant 0 : index
    %c0_165 = arith.constant 0 : index
    %182 = vector.load %arg3[%c6_163, %c0_164, %c0_165] : memref<8x8x4xf32, #tpu.memory_space<vmem>>, vector<1x8x4xf32>
    %183 = vector.shape_cast %182 : vector<1x8x4xf32> to vector<8x4xf32>
    %cst_166 = arith.constant dense<0.000000e+00> : vector<8x4xf32>
    %184 = tpu.matmul %181, %183, %cst_166 {dimension_numbers = #tpu.dot_dimension_numbers<[1], [0], [0], [1], [0, 0, 1, 1], [], []>} : vector<8x8xf32>, vector<8x4xf32>, vector<8x4xf32> -> vector<8x4xf32>
    %c0_167 = arith.constant 0 : index
    %c24_168 = arith.constant 24 : index
    %185 = vector.load %arg4[%c0_167, %c24_168] : memref<8x32xf32, #tpu.memory_space<vmem>>, vector<8x4xf32>
    tpu.vector_store %arg4[%c0_167, %c24_168], %184 {strides = array<i32>} : memref<8x32xf32, #tpu.memory_space<vmem>>, vector<8x4xf32>,
    %c7_169 = arith.constant 7 : index
    %c0_170 = arith.constant 0 : index
    %c0_171 = arith.constant 0 : index
    %186 = vector.load %arg5[%c7_169, %c0_170, %c0_171] : memref<8x8x8xf32, #tpu.memory_space<vmem>>, vector<1x8x8xf32>
    %187 = vector.shape_cast %186 : vector<1x8x8xf32> to vector<8x8xf32>
    %c7_172 = arith.constant 7 : index
    %c0_173 = arith.constant 0 : index
    %c0_174 = arith.constant 0 : index
    %188 = vector.load %arg3[%c7_172, %c0_173, %c0_174] : memref<8x8x4xf32, #tpu.memory_space<vmem>>, vector<1x8x4xf32>
    %189 = vector.shape_cast %188 : vector<1x8x4xf32> to vector<8x4xf32>
    %cst_175 = arith.constant dense<0.000000e+00> : vector<8x4xf32>
    %190 = tpu.matmul %187, %189, %cst_175 {dimension_numbers = #tpu.dot_dimension_numbers<[1], [0], [0], [1], [0, 0, 1, 1], [], []>} : vector<8x8xf32>, vector<8x4xf32>, vector<8x4xf32> -> vector<8x4xf32>
    %c0_176 = arith.constant 0 : index
    %c28 = arith.constant 28 : index
    %191 = vector.load %arg4[%c0_176, %c28] : memref<8x32xf32, #tpu.memory_space<vmem>>, vector<8x4xf32>
    tpu.vector_store %arg4[%c0_176, %c28], %190 {strides = array<i32>} : memref<8x32xf32, #tpu.memory_space<vmem>>, vector<8x4xf32>,
    return
  }
  func.func @transform_0(%arg0: i32) -> (i32, i32) {
    %c0_i32 = arith.constant 0 : i32
    %c0_i32_0 = arith.constant 0 : i32
    return %arg0, %c0_i32 : i32, i32
  }
  func.func @transform_1(%arg0: i32) -> (i32, i32, i32) {
    %c0_i32 = arith.constant 0 : i32
    %c0_i32_0 = arith.constant 0 : i32
    %c0_i32_1 = arith.constant 0 : i32
    %c0_i32_2 = arith.constant 0 : i32
    return %c0_i32, %c0_i32_0, %c0_i32_1 : i32, i32, i32
  }
  func.func @transform_2(%arg0: i32) -> (i32, i32, i32) {
    %c0_i32 = arith.constant 0 : i32
    %c0_i32_0 = arith.constant 0 : i32
    %c0_i32_1 = arith.constant 0 : i32
    %c0_i32_2 = arith.constant 0 : i32
    return %c0_i32, %c0_i32_0, %c0_i32_1 : i32, i32, i32
  }
  func.func @transform_3(%arg0: i32) -> (i32, i32) {
    %c0_i32 = arith.constant 0 : i32
    %c0_i32_0 = arith.constant 0 : i32
    return %arg0, %c0_i32 : i32, i32
  }
}

module attributes {stable_mosaic.version = 11 : i64} {
  func.func @_btt_kernel(%arg0: i32, %arg1: memref<8x32xf32, #tpu.memory_space<vmem>>, %arg2: memref<4x8x16xf32, #tpu.memory_space<vmem>>, %arg3: memref<8x8x4xf32, #tpu.memory_space<vmem>>, %arg4: memref<8x32xf32, #tpu.memory_space<vmem>>, %arg5: memref<8x8x8xf32, #tpu.memory_space<vmem>>) attributes {dimension_semantics = [#tpu.dimension_semantics<parallel>], iteration_bounds = array<i64: 1>, scalar_prefetch = 0 : i64, scratch_operands = 1 : i64, tpu.core_type = #tpu.core_type<tc>, window_params = [{transform_indices = @transform_0, window_bounds = array<i64: 8, 32>}, {pipeline_mode = #tpu.pipeline_mode<synchronous>, transform_indices = @transform_1, window_bounds = array<i64: 4, 8, 16>}, {pipeline_mode = #tpu.pipeline_mode<synchronous>, transform_indices = @transform_2, window_bounds = array<i64: 8, 8, 4>}, {transform_indices = @transform_3, window_bounds = array<i64: 8, 32>}]} {
    %c0 = arith.constant 0 : index
    %c0_0 = arith.constant 0 : index
    %0 = vector.load %arg1[%c0, %c0_0] : memref<8x32xf32, #tpu.memory_space<vmem>>, vector<8x8xf32>
    %c0_1 = arith.constant 0 : index
    %c0_2 = arith.constant 0 : index
    %c0_3 = arith.constant 0 : index
    %1 = vector.load %arg2[%c0_1, %c0_2, %c0_3] : memref<4x8x16xf32, #tpu.memory_space<vmem>>, vector<1x8x16xf32>
    %2 = vector.shape_cast %1 : vector<1x8x16xf32> to vector<8x16xf32>
    %cst = arith.constant dense<0.000000e+00> : vector<8x16xf32>
    %3 = tpu.matmul %0, %2, %cst {dimension_numbers = #tpu.dot_dimension_numbers<[1], [0], [0], [1], [0, 0, 1, 1], [], []>} : vector<8x8xf32>, vector<8x16xf32>, vector<8x16xf32> -> vector<8x16xf32>
    %4 = vector.extract_strided_slice %3 {offsets = [0, 0], sizes = [8, 2], strides = [1, 1]} : vector<8x16xf32> to vector<8x2xf32>
    %c0_4 = arith.constant 0 : index
    %c0_5 = arith.constant 0 : index
    %c0_6 = arith.constant 0 : index
    %5 = vector.load %arg5[%c0_4, %c0_5, %c0_6] : memref<8x8x8xf32, #tpu.memory_space<vmem>>, vector<1x8x2xf32>
    %6 = vector.shape_cast %5 : vector<1x8x2xf32> to vector<8x2xf32>
    %7 = vector.shape_cast %4 : vector<8x2xf32> to vector<1x8x2xf32>
    tpu.vector_store %arg5[%c0_4, %c0_5, %c0_6], %7 {strides = array<i32>} : memref<8x8x8xf32, #tpu.memory_space<vmem>>, vector<1x8x2xf32>,
    %8 = vector.extract_strided_slice %3 {offsets = [0, 2], sizes = [8, 2], strides = [1, 1]} : vector<8x16xf32> to vector<8x2xf32>
    %c1 = arith.constant 1 : index
    %c0_7 = arith.constant 0 : index
    %c0_8 = arith.constant 0 : index
    %9 = vector.load %arg5[%c1, %c0_7, %c0_8] : memref<8x8x8xf32, #tpu.memory_space<vmem>>, vector<1x8x2xf32>
    %10 = vector.shape_cast %9 : vector<1x8x2xf32> to vector<8x2xf32>
    %11 = vector.shape_cast %8 : vector<8x2xf32> to vector<1x8x2xf32>
    tpu.vector_store %arg5[%c1, %c0_7, %c0_8], %11 {strides = array<i32>} : memref<8x8x8xf32, #tpu.memory_space<vmem>>, vector<1x8x2xf32>,
    %12 = vector.extract_strided_slice %3 {offsets = [0, 4], sizes = [8, 2], strides = [1, 1]} : vector<8x16xf32> to vector<8x2xf32>
    %c2 = arith.constant 2 : index
    %c0_9 = arith.constant 0 : index
    %c0_10 = arith.constant 0 : index
    %13 = vector.load %arg5[%c2, %c0_9, %c0_10] : memref<8x8x8xf32, #tpu.memory_space<vmem>>, vector<1x8x2xf32>
    %14 = vector.shape_cast %13 : vector<1x8x2xf32> to vector<8x2xf32>
    %15 = vector.shape_cast %12 : vector<8x2xf32> to vector<1x8x2xf32>
    tpu.vector_store %arg5[%c2, %c0_9, %c0_10], %15 {strides = array<i32>} : memref<8x8x8xf32, #tpu.memory_space<vmem>>, vector<1x8x2xf32>,
    %16 = vector.extract_strided_slice %3 {offsets = [0, 6], sizes = [8, 2], strides = [1, 1]} : vector<8x16xf32> to vector<8x2xf32>
    %c3 = arith.constant 3 : index
    %c0_11 = arith.constant 0 : index
    %c0_12 = arith.constant 0 : index
    %17 = vector.load %arg5[%c3, %c0_11, %c0_12] : memref<8x8x8xf32, #tpu.memory_space<vmem>>, vector<1x8x2xf32>
    %18 = vector.shape_cast %17 : vector<1x8x2xf32> to vector<8x2xf32>
    %19 = vector.shape_cast %16 : vector<8x2xf32> to vector<1x8x2xf32>
    tpu.vector_store %arg5[%c3, %c0_11, %c0_12], %19 {strides = array<i32>} : memref<8x8x8xf32, #tpu.memory_space<vmem>>, vector<1x8x2xf32>,
    %20 = vector.extract_strided_slice %3 {offsets = [0, 8], sizes = [8, 2], strides = [1, 1]} : vector<8x16xf32> to vector<8x2xf32>
    %c4 = arith.constant 4 : index
    %c0_13 = arith.constant 0 : index
    %c0_14 = arith.constant 0 : index
    %21 = vector.load %arg5[%c4, %c0_13, %c0_14] : memref<8x8x8xf32, #tpu.memory_space<vmem>>, vector<1x8x2xf32>
    %22 = vector.shape_cast %21 : vector<1x8x2xf32> to vector<8x2xf32>
    %23 = vector.shape_cast %20 : vector<8x2xf32> to vector<1x8x2xf32>
    tpu.vector_store %arg5[%c4, %c0_13, %c0_14], %23 {strides = array<i32>} : memref<8x8x8xf32, #tpu.memory_space<vmem>>, vector<1x8x2xf32>,
    %24 = vector.extract_strided_slice %3 {offsets = [0, 10], sizes = [8, 2], strides = [1, 1]} : vector<8x16xf32> to vector<8x2xf32>
    %c5 = arith.constant 5 : index
    %c0_15 = arith.constant 0 : index
    %c0_16 = arith.constant 0 : index
    %25 = vector.load %arg5[%c5, %c0_15, %c0_16] : memref<8x8x8xf32, #tpu.memory_space<vmem>>, vector<1x8x2xf32>
    %26 = vector.shape_cast %25 : vector<1x8x2xf32> to vector<8x2xf32>
    %27 = vector.shape_cast %24 : vector<8x2xf32> to vector<1x8x2xf32>
    tpu.vector_store %arg5[%c5, %c0_15, %c0_16], %27 {strides = array<i32>} : memref<8x8x8xf32, #tpu.memory_space<vmem>>, vector<1x8x2xf32>,
    %28 = vector.extract_strided_slice %3 {offsets = [0, 12], sizes = [8, 2], strides = [1, 1]} : vector<8x16xf32> to vector<8x2xf32>
    %c6 = arith.constant 6 : index
    %c0_17 = arith.constant 0 : index
    %c0_18 = arith.constant 0 : index
    %29 = vector.load %arg5[%c6, %c0_17, %c0_18] : memref<8x8x8xf32, #tpu.memory_space<vmem>>, vector<1x8x2xf32>
    %30 = vector.shape_cast %29 : vector<1x8x2xf32> to vector<8x2xf32>
    %31 = vector.shape_cast %28 : vector<8x2xf32> to vector<1x8x2xf32>
    tpu.vector_store %arg5[%c6, %c0_17, %c0_18], %31 {strides = array<i32>} : memref<8x8x8xf32, #tpu.memory_space<vmem>>, vector<1x8x2xf32>,
    %32 = vector.extract_strided_slice %3 {offsets = [0, 14], sizes = [8, 2], strides = [1, 1]} : vector<8x16xf32> to vector<8x2xf32>
    %c7 = arith.constant 7 : index
    %c0_19 = arith.constant 0 : index
    %c0_20 = arith.constant 0 : index
    %33 = vector.load %arg5[%c7, %c0_19, %c0_20] : memref<8x8x8xf32, #tpu.memory_space<vmem>>, vector<1x8x2xf32>
    %34 = vector.shape_cast %33 : vector<1x8x2xf32> to vector<8x2xf32>
    %35 = vector.shape_cast %32 : vector<8x2xf32> to vector<1x8x2xf32>
    tpu.vector_store %arg5[%c7, %c0_19, %c0_20], %35 {strides = array<i32>} : memref<8x8x8xf32, #tpu.memory_space<vmem>>, vector<1x8x2xf32>,
    %c0_21 = arith.constant 0 : index
    %c8 = arith.constant 8 : index
    %36 = vector.load %arg1[%c0_21, %c8] : memref<8x32xf32, #tpu.memory_space<vmem>>, vector<8x8xf32>
    %c1_22 = arith.constant 1 : index
    %c0_23 = arith.constant 0 : index
    %c0_24 = arith.constant 0 : index
    %37 = vector.load %arg2[%c1_22, %c0_23, %c0_24] : memref<4x8x16xf32, #tpu.memory_space<vmem>>, vector<1x8x16xf32>
    %38 = vector.shape_cast %37 : vector<1x8x16xf32> to vector<8x16xf32>
    %cst_25 = arith.constant dense<0.000000e+00> : vector<8x16xf32>
    %39 = tpu.matmul %36, %38, %cst_25 {dimension_numbers = #tpu.dot_dimension_numbers<[1], [0], [0], [1], [0, 0, 1, 1], [], []>} : vector<8x8xf32>, vector<8x16xf32>, vector<8x16xf32> -> vector<8x16xf32>
    %40 = vector.extract_strided_slice %39 {offsets = [0, 0], sizes = [8, 2], strides = [1, 1]} : vector<8x16xf32> to vector<8x2xf32>
    %c0_26 = arith.constant 0 : index
    %c0_27 = arith.constant 0 : index
    %c2_28 = arith.constant 2 : index
    %41 = vector.load %arg5[%c0_26, %c0_27, %c2_28] : memref<8x8x8xf32, #tpu.memory_space<vmem>>, vector<1x8x2xf32>
    %42 = vector.shape_cast %41 : vector<1x8x2xf32> to vector<8x2xf32>
    %43 = vector.shape_cast %40 : vector<8x2xf32> to vector<1x8x2xf32>
    tpu.vector_store %arg5[%c0_26, %c0_27, %c2_28], %43 {strides = array<i32>} : memref<8x8x8xf32, #tpu.memory_space<vmem>>, vector<1x8x2xf32>,
    %44 = vector.extract_strided_slice %39 {offsets = [0, 2], sizes = [8, 2], strides = [1, 1]} : vector<8x16xf32> to vector<8x2xf32>
    %c1_29 = arith.constant 1 : index
    %c0_30 = arith.constant 0 : index
    %c2_31 = arith.constant 2 : index
    %45 = vector.load %arg5[%c1_29, %c0_30, %c2_31] : memref<8x8x8xf32, #tpu.memory_space<vmem>>, vector<1x8x2xf32>
    %46 = vector.shape_cast %45 : vector<1x8x2xf32> to vector<8x2xf32>
    %47 = vector.shape_cast %44 : vector<8x2xf32> to vector<1x8x2xf32>
    tpu.vector_store %arg5[%c1_29, %c0_30, %c2_31], %47 {strides = array<i32>} : memref<8x8x8xf32, #tpu.memory_space<vmem>>, vector<1x8x2xf32>,
    %48 = vector.extract_strided_slice %39 {offsets = [0, 4], sizes = [8, 2], strides = [1, 1]} : vector<8x16xf32> to vector<8x2xf32>
    %c2_32 = arith.constant 2 : index
    %c0_33 = arith.constant 0 : index
    %c2_34 = arith.constant 2 : index
    %49 = vector.load %arg5[%c2_32, %c0_33, %c2_34] : memref<8x8x8xf32, #tpu.memory_space<vmem>>, vector<1x8x2xf32>
    %50 = vector.shape_cast %49 : vector<1x8x2xf32> to vector<8x2xf32>
    %51 = vector.shape_cast %48 : vector<8x2xf32> to vector<1x8x2xf32>
    tpu.vector_store %arg5[%c2_32, %c0_33, %c2_34], %51 {strides = array<i32>} : memref<8x8x8xf32, #tpu.memory_space<vmem>>, vector<1x8x2xf32>,
    %52 = vector.extract_strided_slice %39 {offsets = [0, 6], sizes = [8, 2], strides = [1, 1]} : vector<8x16xf32> to vector<8x2xf32>
    %c3_35 = arith.constant 3 : index
    %c0_36 = arith.constant 0 : index
    %c2_37 = arith.constant 2 : index
    %53 = vector.load %arg5[%c3_35, %c0_36, %c2_37] : memref<8x8x8xf32, #tpu.memory_space<vmem>>, vector<1x8x2xf32>
    %54 = vector.shape_cast %53 : vector<1x8x2xf32> to vector<8x2xf32>
    %55 = vector.shape_cast %52 : vector<8x2xf32> to vector<1x8x2xf32>
    tpu.vector_store %arg5[%c3_35, %c0_36, %c2_37], %55 {strides = array<i32>} : memref<8x8x8xf32, #tpu.memory_space<vmem>>, vector<1x8x2xf32>,
    %56 = vector.extract_strided_slice %39 {offsets = [0, 8], sizes = [8, 2], strides = [1, 1]} : vector<8x16xf32> to vector<8x2xf32>
    %c4_38 = arith.constant 4 : index
    %c0_39 = arith.constant 0 : index
    %c2_40 = arith.constant 2 : index
    %57 = vector.load %arg5[%c4_38, %c0_39, %c2_40] : memref<8x8x8xf32, #tpu.memory_space<vmem>>, vector<1x8x2xf32>
    %58 = vector.shape_cast %57 : vector<1x8x2xf32> to vector<8x2xf32>
    %59 = vector.shape_cast %56 : vector<8x2xf32> to vector<1x8x2xf32>
    tpu.vector_store %arg5[%c4_38, %c0_39, %c2_40], %59 {strides = array<i32>} : memref<8x8x8xf32, #tpu.memory_space<vmem>>, vector<1x8x2xf32>,
    %60 = vector.extract_strided_slice %39 {offsets = [0, 10], sizes = [8, 2], strides = [1, 1]} : vector<8x16xf32> to vector<8x2xf32>
    %c5_41 = arith.constant 5 : index
    %c0_42 = arith.constant 0 : index
    %c2_43 = arith.constant 2 : index
    %61 = vector.load %arg5[%c5_41, %c0_42, %c2_43] : memref<8x8x8xf32, #tpu.memory_space<vmem>>, vector<1x8x2xf32>
    %62 = vector.shape_cast %61 : vector<1x8x2xf32> to vector<8x2xf32>
    %63 = vector.shape_cast %60 : vector<8x2xf32> to vector<1x8x2xf32>
    tpu.vector_store %arg5[%c5_41, %c0_42, %c2_43], %63 {strides = array<i32>} : memref<8x8x8xf32, #tpu.memory_space<vmem>>, vector<1x8x2xf32>,
    %64 = vector.extract_strided_slice %39 {offsets = [0, 12], sizes = [8, 2], strides = [1, 1]} : vector<8x16xf32> to vector<8x2xf32>
    %c6_44 = arith.constant 6 : index
    %c0_45 = arith.constant 0 : index
    %c2_46 = arith.constant 2 : index
    %65 = vector.load %arg5[%c6_44, %c0_45, %c2_46] : memref<8x8x8xf32, #tpu.memory_space<vmem>>, vector<1x8x2xf32>
    %66 = vector.shape_cast %65 : vector<1x8x2xf32> to vector<8x2xf32>
    %67 = vector.shape_cast %64 : vector<8x2xf32> to vector<1x8x2xf32>
    tpu.vector_store %arg5[%c6_44, %c0_45, %c2_46], %67 {strides = array<i32>} : memref<8x8x8xf32, #tpu.memory_space<vmem>>, vector<1x8x2xf32>,
    %68 = vector.extract_strided_slice %39 {offsets = [0, 14], sizes = [8, 2], strides = [1, 1]} : vector<8x16xf32> to vector<8x2xf32>
    %c7_47 = arith.constant 7 : index
    %c0_48 = arith.constant 0 : index
    %c2_49 = arith.constant 2 : index
    %69 = vector.load %arg5[%c7_47, %c0_48, %c2_49] : memref<8x8x8xf32, #tpu.memory_space<vmem>>, vector<1x8x2xf32>
    %70 = vector.shape_cast %69 : vector<1x8x2xf32> to vector<8x2xf32>
    %71 = vector.shape_cast %68 : vector<8x2xf32> to vector<1x8x2xf32>
    tpu.vector_store %arg5[%c7_47, %c0_48, %c2_49], %71 {strides = array<i32>} : memref<8x8x8xf32, #tpu.memory_space<vmem>>, vector<1x8x2xf32>,
    %c0_50 = arith.constant 0 : index
    %c16 = arith.constant 16 : index
    %72 = vector.load %arg1[%c0_50, %c16] : memref<8x32xf32, #tpu.memory_space<vmem>>, vector<8x8xf32>
    %c2_51 = arith.constant 2 : index
    %c0_52 = arith.constant 0 : index
    %c0_53 = arith.constant 0 : index
    %73 = vector.load %arg2[%c2_51, %c0_52, %c0_53] : memref<4x8x16xf32, #tpu.memory_space<vmem>>, vector<1x8x16xf32>
    %74 = vector.shape_cast %73 : vector<1x8x16xf32> to vector<8x16xf32>
    %cst_54 = arith.constant dense<0.000000e+00> : vector<8x16xf32>
    %75 = tpu.matmul %72, %74, %cst_54 {dimension_numbers = #tpu.dot_dimension_numbers<[1], [0], [0], [1], [0, 0, 1, 1], [], []>} : vector<8x8xf32>, vector<8x16xf32>, vector<8x16xf32> -> vector<8x16xf32>
    %76 = vector.extract_strided_slice %75 {offsets = [0, 0], sizes = [8, 2], strides = [1, 1]} : vector<8x16xf32> to vector<8x2xf32>
    %c0_55 = arith.constant 0 : index
    %c0_56 = arith.constant 0 : index
    %c4_57 = arith.constant 4 : index
    %77 = vector.load %arg5[%c0_55, %c0_56, %c4_57] : memref<8x8x8xf32, #tpu.memory_space<vmem>>, vector<1x8x2xf32>
    %78 = vector.shape_cast %77 : vector<1x8x2xf32> to vector<8x2xf32>
    %79 = vector.shape_cast %76 : vector<8x2xf32> to vector<1x8x2xf32>
    tpu.vector_store %arg5[%c0_55, %c0_56, %c4_57], %79 {strides = array<i32>} : memref<8x8x8xf32, #tpu.memory_space<vmem>>, vector<1x8x2xf32>,
    %80 = vector.extract_strided_slice %75 {offsets = [0, 2], sizes = [8, 2], strides = [1, 1]} : vector<8x16xf32> to vector<8x2xf32>
    %c1_58 = arith.constant 1 : index
    %c0_59 = arith.constant 0 : index
    %c4_60 = arith.constant 4 : index
    %81 = vector.load %arg5[%c1_58, %c0_59, %c4_60] : memref<8x8x8xf32, #tpu.memory_space<vmem>>, vector<1x8x2xf32>
    %82 = vector.shape_cast %81 : vector<1x8x2xf32> to vector<8x2xf32>
    %83 = vector.shape_cast %80 : vector<8x2xf32> to vector<1x8x2xf32>
    tpu.vector_store %arg5[%c1_58, %c0_59, %c4_60], %83 {strides = array<i32>} : memref<8x8x8xf32, #tpu.memory_space<vmem>>, vector<1x8x2xf32>,
    %84 = vector.extract_strided_slice %75 {offsets = [0, 4], sizes = [8, 2], strides = [1, 1]} : vector<8x16xf32> to vector<8x2xf32>
    %c2_61 = arith.constant 2 : index
    %c0_62 = arith.constant 0 : index
    %c4_63 = arith.constant 4 : index
    %85 = vector.load %arg5[%c2_61, %c0_62, %c4_63] : memref<8x8x8xf32, #tpu.memory_space<vmem>>, vector<1x8x2xf32>
    %86 = vector.shape_cast %85 : vector<1x8x2xf32> to vector<8x2xf32>
    %87 = vector.shape_cast %84 : vector<8x2xf32> to vector<1x8x2xf32>
    tpu.vector_store %arg5[%c2_61, %c0_62, %c4_63], %87 {strides = array<i32>} : memref<8x8x8xf32, #tpu.memory_space<vmem>>, vector<1x8x2xf32>,
    %88 = vector.extract_strided_slice %75 {offsets = [0, 6], sizes = [8, 2], strides = [1, 1]} : vector<8x16xf32> to vector<8x2xf32>
    %c3_64 = arith.constant 3 : index
    %c0_65 = arith.constant 0 : index
    %c4_66 = arith.constant 4 : index
    %89 = vector.load %arg5[%c3_64, %c0_65, %c4_66] : memref<8x8x8xf32, #tpu.memory_space<vmem>>, vector<1x8x2xf32>
    %90 = vector.shape_cast %89 : vector<1x8x2xf32> to vector<8x2xf32>
    %91 = vector.shape_cast %88 : vector<8x2xf32> to vector<1x8x2xf32>
    tpu.vector_store %arg5[%c3_64, %c0_65, %c4_66], %91 {strides = array<i32>} : memref<8x8x8xf32, #tpu.memory_space<vmem>>, vector<1x8x2xf32>,
    %92 = vector.extract_strided_slice %75 {offsets = [0, 8], sizes = [8, 2], strides = [1, 1]} : vector<8x16xf32> to vector<8x2xf32>
    %c4_67 = arith.constant 4 : index
    %c0_68 = arith.constant 0 : index
    %c4_69 = arith.constant 4 : index
    %93 = vector.load %arg5[%c4_67, %c0_68, %c4_69] : memref<8x8x8xf32, #tpu.memory_space<vmem>>, vector<1x8x2xf32>
    %94 = vector.shape_cast %93 : vector<1x8x2xf32> to vector<8x2xf32>
    %95 = vector.shape_cast %92 : vector<8x2xf32> to vector<1x8x2xf32>
    tpu.vector_store %arg5[%c4_67, %c0_68, %c4_69], %95 {strides = array<i32>} : memref<8x8x8xf32, #tpu.memory_space<vmem>>, vector<1x8x2xf32>,
    %96 = vector.extract_strided_slice %75 {offsets = [0, 10], sizes = [8, 2], strides = [1, 1]} : vector<8x16xf32> to vector<8x2xf32>
    %c5_70 = arith.constant 5 : index
    %c0_71 = arith.constant 0 : index
    %c4_72 = arith.constant 4 : index
    %97 = vector.load %arg5[%c5_70, %c0_71, %c4_72] : memref<8x8x8xf32, #tpu.memory_space<vmem>>, vector<1x8x2xf32>
    %98 = vector.shape_cast %97 : vector<1x8x2xf32> to vector<8x2xf32>
    %99 = vector.shape_cast %96 : vector<8x2xf32> to vector<1x8x2xf32>
    tpu.vector_store %arg5[%c5_70, %c0_71, %c4_72], %99 {strides = array<i32>} : memref<8x8x8xf32, #tpu.memory_space<vmem>>, vector<1x8x2xf32>,
    %100 = vector.extract_strided_slice %75 {offsets = [0, 12], sizes = [8, 2], strides = [1, 1]} : vector<8x16xf32> to vector<8x2xf32>
    %c6_73 = arith.constant 6 : index
    %c0_74 = arith.constant 0 : index
    %c4_75 = arith.constant 4 : index
    %101 = vector.load %arg5[%c6_73, %c0_74, %c4_75] : memref<8x8x8xf32, #tpu.memory_space<vmem>>, vector<1x8x2xf32>
    %102 = vector.shape_cast %101 : vector<1x8x2xf32> to vector<8x2xf32>
    %103 = vector.shape_cast %100 : vector<8x2xf32> to vector<1x8x2xf32>
    tpu.vector_store %arg5[%c6_73, %c0_74, %c4_75], %103 {strides = array<i32>} : memref<8x8x8xf32, #tpu.memory_space<vmem>>, vector<1x8x2xf32>,
    %104 = vector.extract_strided_slice %75 {offsets = [0, 14], sizes = [8, 2], strides = [1, 1]} : vector<8x16xf32> to vector<8x2xf32>
    %c7_76 = arith.constant 7 : index
    %c0_77 = arith.constant 0 : index
    %c4_78 = arith.constant 4 : index
    %105 = vector.load %arg5[%c7_76, %c0_77, %c4_78] : memref<8x8x8xf32, #tpu.memory_space<vmem>>, vector<1x8x2xf32>
    %106 = vector.shape_cast %105 : vector<1x8x2xf32> to vector<8x2xf32>
    %107 = vector.shape_cast %104 : vector<8x2xf32> to vector<1x8x2xf32>
    tpu.vector_store %arg5[%c7_76, %c0_77, %c4_78], %107 {strides = array<i32>} : memref<8x8x8xf32, #tpu.memory_space<vmem>>, vector<1x8x2xf32>,
    %c0_79 = arith.constant 0 : index
    %c24 = arith.constant 24 : index
    %108 = vector.load %arg1[%c0_79, %c24] : memref<8x32xf32, #tpu.memory_space<vmem>>, vector<8x8xf32>
    %c3_80 = arith.constant 3 : index
    %c0_81 = arith.constant 0 : index
    %c0_82 = arith.constant 0 : index
    %109 = vector.load %arg2[%c3_80, %c0_81, %c0_82] : memref<4x8x16xf32, #tpu.memory_space<vmem>>, vector<1x8x16xf32>
    %110 = vector.shape_cast %109 : vector<1x8x16xf32> to vector<8x16xf32>
    %cst_83 = arith.constant dense<0.000000e+00> : vector<8x16xf32>
    %111 = tpu.matmul %108, %110, %cst_83 {dimension_numbers = #tpu.dot_dimension_numbers<[1], [0], [0], [1], [0, 0, 1, 1], [], []>} : vector<8x8xf32>, vector<8x16xf32>, vector<8x16xf32> -> vector<8x16xf32>
    %112 = vector.extract_strided_slice %111 {offsets = [0, 0], sizes = [8, 2], strides = [1, 1]} : vector<8x16xf32> to vector<8x2xf32>
    %c0_84 = arith.constant 0 : index
    %c0_85 = arith.constant 0 : index
    %c6_86 = arith.constant 6 : index
    %113 = vector.load %arg5[%c0_84, %c0_85, %c6_86] : memref<8x8x8xf32, #tpu.memory_space<vmem>>, vector<1x8x2xf32>
    %114 = vector.shape_cast %113 : vector<1x8x2xf32> to vector<8x2xf32>
    %115 = vector.shape_cast %112 : vector<8x2xf32> to vector<1x8x2xf32>
    tpu.vector_store %arg5[%c0_84, %c0_85, %c6_86], %115 {strides = array<i32>} : memref<8x8x8xf32, #tpu.memory_space<vmem>>, vector<1x8x2xf32>,
    %116 = vector.extract_strided_slice %111 {offsets = [0, 2], sizes = [8, 2], strides = [1, 1]} : vector<8x16xf32> to vector<8x2xf32>
    %c1_87 = arith.constant 1 : index
    %c0_88 = arith.constant 0 : index
    %c6_89 = arith.constant 6 : index
    %117 = vector.load %arg5[%c1_87, %c0_88, %c6_89] : memref<8x8x8xf32, #tpu.memory_space<vmem>>, vector<1x8x2xf32>
    %118 = vector.shape_cast %117 : vector<1x8x2xf32> to vector<8x2xf32>
    %119 = vector.shape_cast %116 : vector<8x2xf32> to vector<1x8x2xf32>
    tpu.vector_store %arg5[%c1_87, %c0_88, %c6_89], %119 {strides = array<i32>} : memref<8x8x8xf32, #tpu.memory_space<vmem>>, vector<1x8x2xf32>,
    %120 = vector.extract_strided_slice %111 {offsets = [0, 4], sizes = [8, 2], strides = [1, 1]} : vector<8x16xf32> to vector<8x2xf32>
    %c2_90 = arith.constant 2 : index
    %c0_91 = arith.constant 0 : index
    %c6_92 = arith.constant 6 : index
    %121 = vector.load %arg5[%c2_90, %c0_91, %c6_92] : memref<8x8x8xf32, #tpu.memory_space<vmem>>, vector<1x8x2xf32>
    %122 = vector.shape_cast %121 : vector<1x8x2xf32> to vector<8x2xf32>
    %123 = vector.shape_cast %120 : vector<8x2xf32> to vector<1x8x2xf32>
    tpu.vector_store %arg5[%c2_90, %c0_91, %c6_92], %123 {strides = array<i32>} : memref<8x8x8xf32, #tpu.memory_space<vmem>>, vector<1x8x2xf32>,
    %124 = vector.extract_strided_slice %111 {offsets = [0, 6], sizes = [8, 2], strides = [1, 1]} : vector<8x16xf32> to vector<8x2xf32>
    %c3_93 = arith.constant 3 : index
    %c0_94 = arith.constant 0 : index
    %c6_95 = arith.constant 6 : index
    %125 = vector.load %arg5[%c3_93, %c0_94, %c6_95] : memref<8x8x8xf32, #tpu.memory_space<vmem>>, vector<1x8x2xf32>
    %126 = vector.shape_cast %125 : vector<1x8x2xf32> to vector<8x2xf32>
    %127 = vector.shape_cast %124 : vector<8x2xf32> to vector<1x8x2xf32>
    tpu.vector_store %arg5[%c3_93, %c0_94, %c6_95], %127 {strides = array<i32>} : memref<8x8x8xf32, #tpu.memory_space<vmem>>, vector<1x8x2xf32>,
    %128 = vector.extract_strided_slice %111 {offsets = [0, 8], sizes = [8, 2], strides = [1, 1]} : vector<8x16xf32> to vector<8x2xf32>
    %c4_96 = arith.constant 4 : index
    %c0_97 = arith.constant 0 : index
    %c6_98 = arith.constant 6 : index
    %129 = vector.load %arg5[%c4_96, %c0_97, %c6_98] : memref<8x8x8xf32, #tpu.memory_space<vmem>>, vector<1x8x2xf32>
    %130 = vector.shape_cast %129 : vector<1x8x2xf32> to vector<8x2xf32>
    %131 = vector.shape_cast %128 : vector<8x2xf32> to vector<1x8x2xf32>
    tpu.vector_store %arg5[%c4_96, %c0_97, %c6_98], %131 {strides = array<i32>} : memref<8x8x8xf32, #tpu.memory_space<vmem>>, vector<1x8x2xf32>,
    %132 = vector.extract_strided_slice %111 {offsets = [0, 10], sizes = [8, 2], strides = [1, 1]} : vector<8x16xf32> to vector<8x2xf32>
    %c5_99 = arith.constant 5 : index
    %c0_100 = arith.constant 0 : index
    %c6_101 = arith.constant 6 : index
    %133 = vector.load %arg5[%c5_99, %c0_100, %c6_101] : memref<8x8x8xf32, #tpu.memory_space<vmem>>, vector<1x8x2xf32>
    %134 = vector.shape_cast %133 : vector<1x8x2xf32> to vector<8x2xf32>
    %135 = vector.shape_cast %132 : vector<8x2xf32> to vector<1x8x2xf32>
    tpu.vector_store %arg5[%c5_99, %c0_100, %c6_101], %135 {strides = array<i32>} : memref<8x8x8xf32, #tpu.memory_space<vmem>>, vector<1x8x2xf32>,
    %136 = vector.extract_strided_slice %111 {offsets = [0, 12], sizes = [8, 2], strides = [1, 1]} : vector<8x16xf32> to vector<8x2xf32>
    %c6_102 = arith.constant 6 : index
    %c0_103 = arith.constant 0 : index
    %c6_104 = arith.constant 6 : index
    %137 = vector.load %arg5[%c6_102, %c0_103, %c6_104] : memref<8x8x8xf32, #tpu.memory_space<vmem>>, vector<1x8x2xf32>
    %138 = vector.shape_cast %137 : vector<1x8x2xf32> to vector<8x2xf32>
    %139 = vector.shape_cast %136 : vector<8x2xf32> to vector<1x8x2xf32>
    tpu.vector_store %arg5[%c6_102, %c0_103, %c6_104], %139 {strides = array<i32>} : memref<8x8x8xf32, #tpu.memory_space<vmem>>, vector<1x8x2xf32>,
    %140 = vector.extract_strided_slice %111 {offsets = [0, 14], sizes = [8, 2], strides = [1, 1]} : vector<8x16xf32> to vector<8x2xf32>
    %c7_105 = arith.constant 7 : index
    %c0_106 = arith.constant 0 : index
    %c6_107 = arith.constant 6 : index
    %141 = vector.load %arg5[%c7_105, %c0_106, %c6_107] : memref<8x8x8xf32, #tpu.memory_space<vmem>>, vector<1x8x2xf32>
    %142 = vector.shape_cast %141 : vector<1x8x2xf32> to vector<8x2xf32>
    %143 = vector.shape_cast %140 : vector<8x2xf32> to vector<1x8x2xf32>
    tpu.vector_store %arg5[%c7_105, %c0_106, %c6_107], %143 {strides = array<i32>} : memref<8x8x8xf32, #tpu.memory_space<vmem>>, vector<1x8x2xf32>,
    %c0_108 = arith.constant 0 : index
    %c0_109 = arith.constant 0 : index
    %c0_110 = arith.constant 0 : index
    %144 = vector.load %arg5[%c0_108, %c0_109, %c0_110] : memref<8x8x8xf32, #tpu.memory_space<vmem>>, vector<1x8x8xf32>
    %145 = vector.shape_cast %144 : vector<1x8x8xf32> to vector<8x8xf32>
    %c0_111 = arith.constant 0 : index
    %c0_112 = arith.constant 0 : index
    %c0_113 = arith.constant 0 : index
    %146 = vector.load %arg3[%c0_111, %c0_112, %c0_113] : memref<8x8x4xf32, #tpu.memory_space<vmem>>, vector<1x8x4xf32>
    %147 = vector.shape_cast %146 : vector<1x8x4xf32> to vector<8x4xf32>
    %cst_114 = arith.constant dense<0.000000e+00> : vector<8x4xf32>
    %148 = tpu.matmul %145, %147, %cst_114 {dimension_numbers = #tpu.dot_dimension_numbers<[1], [0], [0], [1], [0, 0, 1, 1], [], []>} : vector<8x8xf32>, vector<8x4xf32>, vector<8x4xf32> -> vector<8x4xf32>
    %c0_115 = arith.constant 0 : index
    %c0_116 = arith.constant 0 : index
    %149 = vector.load %arg4[%c0_115, %c0_116] : memref<8x32xf32, #tpu.memory_space<vmem>>, vector<8x4xf32>
    tpu.vector_store %arg4[%c0_115, %c0_116], %148 {strides = array<i32>} : memref<8x32xf32, #tpu.memory_space<vmem>>, vector<8x4xf32>,
    %c1_117 = arith.constant 1 : index
    %c0_118 = arith.constant 0 : index
    %c0_119 = arith.constant 0 : index
    %150 = vector.load %arg5[%c1_117, %c0_118, %c0_119] : memref<8x8x8xf32, #tpu.memory_space<vmem>>, vector<1x8x8xf32>
    %151 = vector.shape_cast %150 : vector<1x8x8xf32> to vector<8x8xf32>
    %c1_120 = arith.constant 1 : index
    %c0_121 = arith.constant 0 : index
    %c0_122 = arith.constant 0 : index
    %152 = vector.load %arg3[%c1_120, %c0_121, %c0_122] : memref<8x8x4xf32, #tpu.memory_space<vmem>>, vector<1x8x4xf32>
    %153 = vector.shape_cast %152 : vector<1x8x4xf32> to vector<8x4xf32>
    %cst_123 = arith.constant dense<0.000000e+00> : vector<8x4xf32>
    %154 = tpu.matmul %151, %153, %cst_123 {dimension_numbers = #tpu.dot_dimension_numbers<[1], [0], [0], [1], [0, 0, 1, 1], [], []>} : vector<8x8xf32>, vector<8x4xf32>, vector<8x4xf32> -> vector<8x4xf32>
    %c0_124 = arith.constant 0 : index
    %c4_125 = arith.constant 4 : index
    %155 = vector.load %arg4[%c0_124, %c4_125] : memref<8x32xf32, #tpu.memory_space<vmem>>, vector<8x4xf32>
    tpu.vector_store %arg4[%c0_124, %c4_125], %154 {strides = array<i32>} : memref<8x32xf32, #tpu.memory_space<vmem>>, vector<8x4xf32>,
    %c2_126 = arith.constant 2 : index
    %c0_127 = arith.constant 0 : index
    %c0_128 = arith.constant 0 : index
    %156 = vector.load %arg5[%c2_126, %c0_127, %c0_128] : memref<8x8x8xf32, #tpu.memory_space<vmem>>, vector<1x8x8xf32>
    %157 = vector.shape_cast %156 : vector<1x8x8xf32> to vector<8x8xf32>
    %c2_129 = arith.constant 2 : index
    %c0_130 = arith.constant 0 : index
    %c0_131 = arith.constant 0 : index
    %158 = vector.load %arg3[%c2_129, %c0_130, %c0_131] : memref<8x8x4xf32, #tpu.memory_space<vmem>>, vector<1x8x4xf32>
    %159 = vector.shape_cast %158 : vector<1x8x4xf32> to vector<8x4xf32>
    %cst_132 = arith.constant dense<0.000000e+00> : vector<8x4xf32>
    %160 = tpu.matmul %157, %159, %cst_132 {dimension_numbers = #tpu.dot_dimension_numbers<[1], [0], [0], [1], [0, 0, 1, 1], [], []>} : vector<8x8xf32>, vector<8x4xf32>, vector<8x4xf32> -> vector<8x4xf32>
    %c0_133 = arith.constant 0 : index
    %c8_134 = arith.constant 8 : index
    %161 = vector.load %arg4[%c0_133, %c8_134] : memref<8x32xf32, #tpu.memory_space<vmem>>, vector<8x4xf32>
    tpu.vector_store %arg4[%c0_133, %c8_134], %160 {strides = array<i32>} : memref<8x32xf32, #tpu.memory_space<vmem>>, vector<8x4xf32>,
    %c3_135 = arith.constant 3 : index
    %c0_136 = arith.constant 0 : index
    %c0_137 = arith.constant 0 : index
    %162 = vector.load %arg5[%c3_135, %c0_136, %c0_137] : memref<8x8x8xf32, #tpu.memory_space<vmem>>, vector<1x8x8xf32>
    %163 = vector.shape_cast %162 : vector<1x8x8xf32> to vector<8x8xf32>
    %c3_138 = arith.constant 3 : index
    %c0_139 = arith.constant 0 : index
    %c0_140 = arith.constant 0 : index
    %164 = vector.load %arg3[%c3_138, %c0_139, %c0_140] : memref<8x8x4xf32, #tpu.memory_space<vmem>>, vector<1x8x4xf32>
    %165 = vector.shape_cast %164 : vector<1x8x4xf32> to vector<8x4xf32>
    %cst_141 = arith.constant dense<0.000000e+00> : vector<8x4xf32>
    %166 = tpu.matmul %163, %165, %cst_141 {dimension_numbers = #tpu.dot_dimension_numbers<[1], [0], [0], [1], [0, 0, 1, 1], [], []>} : vector<8x8xf32>, vector<8x4xf32>, vector<8x4xf32> -> vector<8x4xf32>
    %c0_142 = arith.constant 0 : index
    %c12 = arith.constant 12 : index
    %167 = vector.load %arg4[%c0_142, %c12] : memref<8x32xf32, #tpu.memory_space<vmem>>, vector<8x4xf32>
    tpu.vector_store %arg4[%c0_142, %c12], %166 {strides = array<i32>} : memref<8x32xf32, #tpu.memory_space<vmem>>, vector<8x4xf32>,
    %c4_143 = arith.constant 4 : index
    %c0_144 = arith.constant 0 : index
    %c0_145 = arith.constant 0 : index
    %168 = vector.load %arg5[%c4_143, %c0_144, %c0_145] : memref<8x8x8xf32, #tpu.memory_space<vmem>>, vector<1x8x8xf32>
    %169 = vector.shape_cast %168 : vector<1x8x8xf32> to vector<8x8xf32>
    %c4_146 = arith.constant 4 : index
    %c0_147 = arith.constant 0 : index
    %c0_148 = arith.constant 0 : index
    %170 = vector.load %arg3[%c4_146, %c0_147, %c0_148] : memref<8x8x4xf32, #tpu.memory_space<vmem>>, vector<1x8x4xf32>
    %171 = vector.shape_cast %170 : vector<1x8x4xf32> to vector<8x4xf32>
    %cst_149 = arith.constant dense<0.000000e+00> : vector<8x4xf32>
    %172 = tpu.matmul %169, %171, %cst_149 {dimension_numbers = #tpu.dot_dimension_numbers<[1], [0], [0], [1], [0, 0, 1, 1], [], []>} : vector<8x8xf32>, vector<8x4xf32>, vector<8x4xf32> -> vector<8x4xf32>
    %c0_150 = arith.constant 0 : index
    %c16_151 = arith.constant 16 : index
    %173 = vector.load %arg4[%c0_150, %c16_151] : memref<8x32xf32, #tpu.memory_space<vmem>>, vector<8x4xf32>
    tpu.vector_store %arg4[%c0_150, %c16_151], %172 {strides = array<i32>} : memref<8x32xf32, #tpu.memory_space<vmem>>, vector<8x4xf32>,
    %c5_152 = arith.constant 5 : index
    %c0_153 = arith.constant 0 : index
    %c0_154 = arith.constant 0 : index
    %174 = vector.load %arg5[%c5_152, %c0_153, %c0_154] : memref<8x8x8xf32, #tpu.memory_space<vmem>>, vector<1x8x8xf32>
    %175 = vector.shape_cast %174 : vector<1x8x8xf32> to vector<8x8xf32>
    %c5_155 = arith.constant 5 : index
    %c0_156 = arith.constant 0 : index
    %c0_157 = arith.constant 0 : index
    %176 = vector.load %arg3[%c5_155, %c0_156, %c0_157] : memref<8x8x4xf32, #tpu.memory_space<vmem>>, vector<1x8x4xf32>
    %177 = vector.shape_cast %176 : vector<1x8x4xf32> to vector<8x4xf32>
    %cst_158 = arith.constant dense<0.000000e+00> : vector<8x4xf32>
    %178 = tpu.matmul %175, %177, %cst_158 {dimension_numbers = #tpu.dot_dimension_numbers<[1], [0], [0], [1], [0, 0, 1, 1], [], []>} : vector<8x8xf32>, vector<8x4xf32>, vector<8x4xf32> -> vector<8x4xf32>
    %c0_159 = arith.constant 0 : index
    %c20 = arith.constant 20 : index
    %179 = vector.load %arg4[%c0_159, %c20] : memref<8x32xf32, #tpu.memory_space<vmem>>, vector<8x4xf32>
    tpu.vector_store %arg4[%c0_159, %c20], %178 {strides = array<i32>} : memref<8x32xf32, #tpu.memory_space<vmem>>, vector<8x4xf32>,
    %c6_160 = arith.constant 6 : index
    %c0_161 = arith.constant 0 : index
    %c0_162 = arith.constant 0 : index
    %180 = vector.load %arg5[%c6_160, %c0_161, %c0_162] : memref<8x8x8xf32, #tpu.memory_space<vmem>>, vector<1x8x8xf32>
    %181 = vector.shape_cast %180 : vector<1x8x8xf32> to vector<8x8xf32>
    %c6_163 = arith.constant 6 : index
    %c0_164 = arith.constant 0 : index
    %c0_165 = arith.constant 0 : index
    %182 = vector.load %arg3[%c6_163, %c0_164, %c0_165] : memref<8x8x4xf32, #tpu.memory_space<vmem>>, vector<1x8x4xf32>
    %183 = vector.shape_cast %182 : vector<1x8x4xf32> to vector<8x4xf32>
    %cst_166 = arith.constant dense<0.000000e+00> : vector<8x4xf32>
    %184 = tpu.matmul %181, %183, %cst_166 {dimension_numbers = #tpu.dot_dimension_numbers<[1], [0], [0], [1], [0, 0, 1, 1], [], []>} : vector<8x8xf32>, vector<8x4xf32>, vector<8x4xf32> -> vector<8x4xf32>
    %c0_167 = arith.constant 0 : index
    %c24_168 = arith.constant 24 : index
    %185 = vector.load %arg4[%c0_167, %c24_168] : memref<8x32xf32, #tpu.memory_space<vmem>>, vector<8x4xf32>
    tpu.vector_store %arg4[%c0_167, %c24_168], %184 {strides = array<i32>} : memref<8x32xf32, #tpu.memory_space<vmem>>, vector<8x4xf32>,
    %c7_169 = arith.constant 7 : index
    %c0_170 = arith.constant 0 : index
    %c0_171 = arith.constant 0 : index
    %186 = vector.load %arg5[%c7_169, %c0_170, %c0_171] : memref<8x8x8xf32, #tpu.memory_space<vmem>>, vector<1x8x8xf32>
    %187 = vector.shape_cast %186 : vector<1x8x8xf32> to vector<8x8xf32>
    %c7_172 = arith.constant 7 : index
    %c0_173 = arith.constant 0 : index
    %c0_174 = arith.constant 0 : index
    %188 = vector.load %arg3[%c7_172, %c0_173, %c0_174] : memref<8x8x4xf32, #tpu.memory_space<vmem>>, vector<1x8x4xf32>
    %189 = vector.shape_cast %188 : vector<1x8x4xf32> to vector<8x4xf32>
    %cst_175 = arith.constant dense<0.000000e+00> : vector<8x4xf32>
    %190 = tpu.matmul %187, %189, %cst_175 {dimension_numbers = #tpu.dot_dimension_numbers<[1], [0], [0], [1], [0, 0, 1, 1], [], []>} : vector<8x8xf32>, vector<8x4xf32>, vector<8x4xf32> -> vector<8x4xf32>
    %c0_176 = arith.constant 0 : index
    %c28 = arith.constant 28 : index
    %191 = vector.load %arg4[%c0_176, %c28] : memref<8x32xf32, #tpu.memory_space<vmem>>, vector<8x4xf32>
    tpu.vector_store %arg4[%c0_176, %c28], %190 {strides = array<i32>} : memref<8x32xf32, #tpu.memory_space<vmem>>, vector<8x4xf32>,
    return
  }
  func.func @transform_0(%arg0: i32) -> (i32, i32) {
    %c0_i32 = arith.constant 0 : i32
    %c0_i32_0 = arith.constant 0 : i32
    return %arg0, %c0_i32 : i32, i32
  }
  func.func @transform_1(%arg0: i32) -> (i32, i32, i32) {
    %c0_i32 = arith.constant 0 : i32
    %c0_i32_0 = arith.constant 0 : i32
    %c0_i32_1 = arith.constant 0 : i32
    %c0_i32_2 = arith.constant 0 : i32
    return %c0_i32, %c0_i32_0, %c0_i32_1 : i32, i32, i32
  }
  func.func @transform_2(%arg0: i32) -> (i32, i32, i32) {
    %c0_i32 = arith.constant 0 : i32
    %c0_i32_0 = arith.constant 0 : i32
    %c0_i32_1 = arith.constant 0 : i32
    %c0_i32_2 = arith.constant 0 : i32
    return %c0_i32, %c0_i32_0, %c0_i32_1 : i32, i32, i32
  }
  func.func @transform_3(%arg0: i32) -> (i32, i32) {
    %c0_i32 = arith.constant 0 : i32
    %c0_i32_0 = arith.constant 0 : i32
    return %arg0, %c0_i32 : i32, i32
  }
}

</mosaic_0001>

<bundles_post_ra>
// kernel: tpu_custom_call.1
= control target key start
LH: loop header
LB: loop body
LE: loop exit
PB: predicated region body
PF: predicated region fallthrough
CT: control target
= control target key end

     0   :  { %vm17_vm0 = vcmask 64512   ;;  %s1272_s16 = smov 120   ;;  %v1273_v2 = vmov 0.0   ;;  %vm1274_vm1 = vmmov 0   ;;  %s1472_s0 = inlined_call_operand.vmem [shape: f32[8,32], index: 0, kind: input, shape index: {}]   ;;  %s1473_s1 = inlined_call_operand.vmem [shape: f32[4,8,16], index: 1, kind: input, shape index: {}]   ;;  %s1474_s2 = inlined_call_operand.vmem [shape: f32[8,8,4], index: 2, kind: input, shape index: {}]   ;;  %s1475_s3 = inlined_call_operand.hbm [shape: f32[8,32], index: 3, kind: output, shape index: {}]  }
   0x1   :  { %v129_v0 = vld [vmem:[%s1472_s0] sm:$0xff]  ;;  %1167 = vmatprep.subr.mxu0 %v1273_v2  ;;  %1169 = vmatprep.mubr.msk.f32.mxu0 %vm1274_vm1, %v1273_v2  ;;  %v1122_v3 = vld [vmem:[%s1473_s1 + $0x8] sm:$0xff] }
   0x2   :  { %v16_v1 = vld [vmem:[%s1473_s1] sm:$0xff]  ;;  %133 = vrot.lane.b32.xlu0 %v129_v0, %s1272_s16 }
   0x3   :  { %1168 = vmatpush3.msra.mxu0 %v16_v1 }
   0x4   :  { %8 = vsyncpa [#allocation4], 0  ;;  %1170 = vmatmul.mubr.msk.f32.vlgmr.msra.gmra.mrb[0].mxu0 %vm17_vm0, %v129_v0  ;;  %s1275_s0 = smov 104   ;;  %1172 = vmatprep.subr.mxu1 %v1273_v2  ;;  %v1124_v4 = vld [vmem:[%s1473_s1 + $0x10] sm:$0xff]  ;;  %s1276_s21 = smov 112   ;;  %v1126_v5 = vld [vmem:[%s1473_s1 + $0x18] sm:$0xff] }
   0x5   :  { %351 = vrot.lane.b32.xlu1 %v129_v0, %s1275_s0  ;;  %1174 = vmatprep.mubr.msk.f32.mxu1 %vm1274_vm1, %v1273_v2  ;;  %vm91_vm2 = vcmask 15360   ;;  %s1277_s1 = smov 126   ;;  %s1278_s24 = smov 124   ;;  %vm211_vm3 = vcmask 31760   ;;  %v457_v24 = vld [vmem:[%s1474_s2] sm:$0xff]  ;;  %v1129_v25 = vld [vmem:[%s1474_s2 + $0x8] sm:$0xff] }
   0x6   :  { %242 = vrot.lane.b32.xlu0 %v129_v0, %s1276_s21  ;;  %1173 = vmatpush3.msra.mxu1 %v1122_v3  ;;  %s1279_s25 = smov 122   ;;  %s1280_s26 = smov 118   ;;  %vm320_vm4 = vcmask 48160   ;;  %vm429_vm5 = vcmask 64560   ;;  %v1131_v43 = vld [vmem:[%s1474_s2 + $0x10] sm:$0xff]  ;;  %v1133_v46 = vld [vmem:[%s1474_s2 + $0x18] sm:$0xff] }
   0x7   :  { %1177 = vmatprep.subr.mxu0 %v1273_v2  ;;  %1179 = vmatprep.mubr.msk.f32.mxu0 %vm1274_vm1, %v1273_v2  ;;  %s1281_s27 = smov 116   ;;  %s1282_s28 = smov 114   ;;  %v1135_v50 = vld [vmem:[%s1474_s2 + $0x20] sm:$0xff]  ;;  %v1137_v51 = vld [vmem:[%s1474_s2 + $0x28] sm:$0xff]  ;;  %v1139_v54 = vld [vmem:[%s1474_s2 + $0x30] sm:$0xff]  ;;  %vm531_vm6 = vcmask 31744  }
   0x8   :  { %1178 = vmatpush3.msra.mxu0 %v1124_v4  ;;  %1182 = vmatprep.subr.mxu1 %v1273_v2  ;;  %s1283_s29 = smov 2   ;;  %s1284_s30 = smov 4   ;;  %v1141_v57 = vld [vmem:[%s1474_s2 + $0x38] sm:$0xff]  ;;  %vm613_vm7 = vcmask 64544   ;;  %vm695_vm8 = vcmask 97344   ;;  %vm777_vm9 = vcmask 130144  }
   0x9   :  { %1187 = vmatprep.subr.mxu0 %v1273_v2  ;;  %s1285_s8 = smov 6   ;;  %s1286_s2 = smov 8   ;;  %vm859_vm10 = vcmask 162944   ;;  %vm941_vm11 = vcmask 195744   ;;  %vm1023_vm12 = vcmask 228544   ;;  %vm1105_vm13 = vcmask 261344  }
   0xa   :  { %s1287_s20 = smov 12   ;;  %s1288_s21 = smov 16  }
   0xb   :  { %s1289_s22 = smov 20   ;;  %s1290_s23 = smov 28  }
  0x74   :  { %v134_v6 = vpop.permute.xlu0 %133 }
  0x75   :  { %1175 = vmatmul.mubr.msk.f32.vlgmr.msra.gmra.mrb[0].mxu1 %vm17_vm0, %v134_v6 }
  0x76   :  { %1183 = vmatpush3.msra.mxu1 %v1126_v5  ;;  %1184 = vmatprep.mubr.msk.f32.mxu1 %vm1274_vm1, %v1273_v2 }
  0x77   :  { %v352_v7 = vpop.permute.xlu1 %351  ;;  %1192 = vmatprep.subr.mxu1 %v1273_v2 }
  0x78   :  { %v243_v8 = vpop.permute.xlu0 %242 }
  0x79   :  { %1180 = vmatmul.mubr.msk.f32.vlgmr.msra.gmra.mrb[2].mxu0 %vm17_vm0, %v243_v8  ;;  %1185 = vmatmul.mubr.msk.f32.vlgmr.msra.gmra.mrb[2].mxu1 %vm17_vm0, %v352_v7 }
  0x7a   :  { %1189 = vmatprep.mubr.msk.f32.mxu0 %vm1274_vm1, %v1273_v2  ;;  %1194 = vmatprep.mubr.msk.f32.mxu1 %vm1274_vm1, %v1273_v2 }
  0x7b   :  { %1188 = vmatpush3.msra.mxu0 %v457_v24  ;;  %1193 = vmatpush3.msra.mxu1 %v1129_v25 }
  0x7c   :  { %1197 = vmatprep.subr.mxu0 %v1273_v2  ;;  %1202 = vmatprep.subr.mxu1 %v1273_v2 }
  0xd7   :  { %v87_v9 = vpop.f32.mrb[0].mxu0 }
  0xd8   :  { %94 = vrot.lane.b32.xlu1 %v87_v9, %s1277_s1  ;;  %99 = vrot.lane.b32.xlu0 %v87_v9, %s1278_s24  ;;  %v1171_v10 = vpop.f32.mrb[1].mxu0  ;;  %92 = vst.msk [vmem:[#allocation2] sm:$0xff] %vm91_vm2, %v87_v9 }
  0xdc   :  { %104 = vrot.lane.b32.xlu0 %v87_v9, %s1279_s25  ;;  %109 = vrot.lane.b32.xlu1 %v87_v9, %s1272_s16 }
  0xe0   :  { %114 = vrot.lane.b32.xlu0 %v87_v9, %s1280_s26 }
  0xe4   :  { %119 = vrot.lane.b32.xlu0 %v87_v9, %s1281_s27 }
  0xe8   :  { %124 = vrot.lane.b32.xlu0 %v87_v9, %s1282_s28 }
 0x148   :  { %v203_v11 = vpop.f32.mrb[0].mxu1 }
 0x149   :  { %v1176_v12 = vpop.f32.mrb[1].mxu1  ;;  %208 = vrot.lane.b32.xlu0 %v203_v11, %s1283_s29 }
 0x14a   :  { %v95_v13 = vpop.permute.xlu1 %94  ;;  %v100_v14 = vpop.permute.xlu0 %99 }
 0x14b   :  { %98 = vst.msk [vmem:[#allocation2 + $0x8] sm:$0xff] %vm91_vm2, %v95_v13  ;;  %103 = vst.msk [vmem:[#allocation2 + $0x10] sm:$0xff] %vm91_vm2, %v100_v14 }
 0x14c   :  { %213 = vst.msk [vmem:[#allocation2 + $0x8] sm:$0xff] %vm211_vm3, %v203_v11  ;;  %v312_v15 = vpop.f32.mrb[2].mxu0  ;;  %v421_v16 = vpop.f32.mrb[2].mxu1 }
 0x14d   :  { %322 = vrot.lane.b32.xlu0 %v312_v15, %s1283_s29  ;;  %317 = vrot.lane.b32.xlu1 %v312_v15, %s1284_s30  ;;  %v1181_v17 = vpop.f32.mrb[3].mxu0  ;;  %v1186_v18 = vpop.f32.mrb[3].mxu1 }
 0x14e   :  { %v105_v19 = vpop.permute.xlu0 %104  ;;  %v110_v20 = vpop.permute.xlu1 %109 }
 0x14f   :  { %108 = vst.msk [vmem:[#allocation2 + $0x18] sm:$0xff] %vm91_vm2, %v105_v19  ;;  %113 = vst.msk [vmem:[#allocation2 + $0x20] sm:$0xff] %vm91_vm2, %v110_v20 }
 0x151   :  { %218 = vrot.lane.b32.xlu0 %v203_v11, %s1278_s24  ;;  %214 = vrot.lane.b32.xlu1 %v203_v11, %s1277_s1 }
 0x152   :  { %v115_v21 = vpop.permute.xlu0 %114 }
 0x153   :  { %118 = vst.msk [vmem:[#allocation2 + $0x28] sm:$0xff] %vm91_vm2, %v115_v21 }
 0x155   :  { %226 = vrot.lane.b32.xlu0 %v203_v11, %s1272_s16  ;;  %327 = vrot.lane.b32.xlu1 %v312_v15, %s1277_s1 }
 0x156   :  { %v120_v22 = vpop.permute.xlu0 %119 }
 0x157   :  { %123 = vst.msk [vmem:[#allocation2 + $0x30] sm:$0xff] %vm91_vm2, %v120_v22 }
 0x159   :  { %335 = vrot.lane.b32.xlu0 %v312_v15, %s1279_s25  ;;  %222 = vrot.lane.b32.xlu1 %v203_v11, %s1279_s25 }
 0x15a   :  { %v125_v23 = vpop.permute.xlu0 %124 }
 0x15b   :  { %128 = vst.msk [vmem:[#allocation2 + $0x38] sm:$0xff] %vm91_vm2, %v125_v23 }
 0x15d   :  { %435 = vrot.lane.b32.xlu0 %v421_v16, %s1283_s29  ;;  %331 = vrot.lane.b32.xlu1 %v312_v15, %s1278_s24 }
 0x161   :  { %234 = vrot.lane.b32.xlu0 %v203_v11, %s1281_s27  ;;  %230 = vrot.lane.b32.xlu1 %v203_v11, %s1280_s26 }
 0x165   :  { %343 = vrot.lane.b32.xlu0 %v312_v15, %s1280_s26  ;;  %426 = vrot.lane.b32.xlu1 %v421_v16, %s1285_s8 }
 0x169   :  { %452 = vrot.lane.b32.xlu0 %v421_v16, %s1272_s16  ;;  %431 = vrot.lane.b32.xlu1 %v421_v16, %s1284_s30 }
 0x16d   :  { %339 = vrot.lane.b32.xlu1 %v312_v15, %s1272_s16 }
 0x171   :  { %440 = vrot.lane.b32.xlu1 %v421_v16, %s1277_s1  ;;  %s1291_s1 = smov 24  }
 0x175   :  { %444 = vrot.lane.b32.xlu1 %v421_v16, %s1278_s24  ;;  %s1292_s24 = smov [#allocation3]  }
 0x179   :  { %448 = vrot.lane.b32.xlu1 %v421_v16, %s1279_s25  ;;  %s1113_s25 = sshll.u32 %s1292_s24, 4  ;;  %s1114_s25 = int_to_ptr.vmem [resolvable:$true] %s1113_s25 }
 0x17a   :  { %s1248_s26 = scalar_lea.vmem %s1114_s25, 128  ;;  %p1253_p1 = scmp.lt.s32.totalorder %s1114_s25, %s1114_s25 }
 0x17b   :  { %p1249_p0 = scmp.ne.s32.totalorder %s1114_s25, %s1248_s26  ;;  %p1254_p2 = scmp.lt.s32.totalorder %s1248_s26, %s1248_s26 }
 0x17d   :  { %p1255_p3 = por %p1254_p2, %p1253_p1 }
 0x17f   :  { %p1256_p4 = pnand %p1255_p3, %p1249_p0 }
 0x1bb   :  { %v209_v26 = vpop.permute.xlu0 %208 }
 0x1bc   :  { %212 = vst.msk [vmem:[#allocation2] sm:$0xff] %vm211_vm3, %v209_v26 }
 0x1bf   :  { %v323_v27 = vpop.permute.xlu0 %322  ;;  %v318_v28 = vpop.permute.xlu1 %317 }
 0x1c0   :  { %325 = vst.msk [vmem:[#allocation2 + $0x8] sm:$0xff] %vm320_vm4, %v323_v27  ;;  %321 = vst.msk [vmem:[#allocation2] sm:$0xff] %vm320_vm4, %v318_v28 }
 0x1c3   :  { %v219_v29 = vpop.permute.xlu0 %218  ;;  %v215_v30 = vpop.permute.xlu1 %214 }
 0x1c4   :  { %221 = vst.msk [vmem:[#allocation2 + $0x18] sm:$0xff] %vm211_vm3, %v219_v29  ;;  %217 = vst.msk [vmem:[#allocation2 + $0x10] sm:$0xff] %vm211_vm3, %v215_v30 }
 0x1c5   :  { %326 = vst.msk [vmem:[#allocation2 + $0x10] sm:$0xff] %vm320_vm4, %v312_v15 }
 0x1c7   :  { %v227_v31 = vpop.permute.xlu0 %226  ;;  %v328_v32 = vpop.permute.xlu1 %327 }
 0x1c8   :  { %229 = vst.msk [vmem:[#allocation2 + $0x28] sm:$0xff] %vm211_vm3, %v227_v31 }
 0x1c9   :  { %330 = vst.msk [vmem:[#allocation2 + $0x18] sm:$0xff] %vm320_vm4, %v328_v32 }
 0x1ca   :  { %439 = vst.msk [vmem:[#allocation2 + $0x18] sm:$0xff] %vm429_vm5, %v421_v16 }
 0x1cb   :  { %v336_v33 = vpop.permute.xlu0 %335  ;;  %v223_v34 = vpop.permute.xlu1 %222 }
 0x1cc   :  { %338 = vst.msk [vmem:[#allocation2 + $0x28] sm:$0xff] %vm320_vm4, %v336_v33 }
 0x1cd   :  { %225 = vst.msk [vmem:[#allocation2 + $0x20] sm:$0xff] %vm211_vm3, %v223_v34 }
 0x1cf   :  { %v436_v35 = vpop.permute.xlu0 %435  ;;  %v332_v36 = vpop.permute.xlu1 %331 }
 0x1d0   :  { %438 = vst.msk [vmem:[#allocation2 + $0x10] sm:$0xff] %vm429_vm5, %v436_v35 }
 0x1d1   :  { %334 = vst.msk [vmem:[#allocation2 + $0x20] sm:$0xff] %vm320_vm4, %v332_v36  ;;  %v697_v53 = vld [vmem:[#allocation2 + $0x18] sm:$0xff] }
 0x1d3   :  { %v235_v37 = vpop.permute.xlu0 %234  ;;  %v231_v38 = vpop.permute.xlu1 %230 }
 0x1d4   :  { %237 = vst.msk [vmem:[#allocation2 + $0x38] sm:$0xff] %vm211_vm3, %v235_v37  ;;  %233 = vst.msk [vmem:[#allocation2 + $0x30] sm:$0xff] %vm211_vm3, %v231_v38 }
 0x1d7   :  { %v344_v39 = vpop.permute.xlu0 %343  ;;  %v427_v40 = vpop.permute.xlu1 %426  ;;  %v615_v49 = vld [vmem:[#allocation2 + $0x10] sm:$0xff] }
 0x1d8   :  { %346 = vst.msk [vmem:[#allocation2 + $0x38] sm:$0xff] %vm320_vm4, %v344_v39 }
 0x1d9   :  { %430 = vst.msk [vmem:[#allocation2] sm:$0xff] %vm429_vm5, %v427_v40 }
 0x1db   :  { %v453_v41 = vpop.permute.xlu0 %452  ;;  %v432_v42 = vpop.permute.xlu1 %431 }
 0x1dc   :  { %455 = vst.msk [vmem:[#allocation2 + $0x38] sm:$0xff] %vm429_vm5, %v453_v41  ;;  %434 = vst.msk [vmem:[#allocation2 + $0x8] sm:$0xff] %vm429_vm5, %v432_v42 }
 0x1df   :  { %v340_v44 = vpop.permute.xlu1 %339 }
 0x1e0   :  { %v456_v45 = vld [vmem:[#allocation2] sm:$0xff]  ;;  %342 = vst.msk [vmem:[#allocation2 + $0x30] sm:$0xff] %vm320_vm4, %v340_v44 }
 0x1e1   :  { %1190 = vmatmul.mubr.msk.f32.vlgmr.msra.gmra.mrb[4].mxu0 %vm17_vm0, %v456_v45 }
 0x1e2   :  { %1198 = vmatpush3.msra.mxu0 %v1131_v43  ;;  %1199 = vmatprep.mubr.msk.f32.mxu0 %vm1274_vm1, %v1273_v2 }
 0x1e3   :  { %1207 = vmatprep.subr.mxu0 %v1273_v2  ;;  %v441_v47 = vpop.permute.xlu1 %440  ;;  %v533_v48 = vld [vmem:[#allocation2 + $0x8] sm:$0xff]  ;;  %v1025_v60 = vld [vmem:[#allocation2 + $0x38] sm:$0xff] }
 0x1e4   :  { %443 = vst.msk [vmem:[#allocation2 + $0x20] sm:$0xff] %vm429_vm5, %v441_v47  ;;  %1195 = vmatmul.mubr.msk.f32.vlgmr.msra.gmra.mrb[4].mxu1 %vm17_vm0, %v533_v48 }
 0x1e5   :  { %1200 = vmatmul.mubr.msk.f32.vlgmr.msra.gmra.mrb[6].mxu0 %vm17_vm0, %v615_v49  ;;  %1203 = vmatpush3.msra.mxu1 %v1133_v46 }
 0x1e6   :  { %1204 = vmatprep.mubr.msk.f32.mxu1 %vm1274_vm1, %v1273_v2  ;;  %1208 = vmatpush3.msra.mxu0 %v1135_v50 }
 0x1e7   :  { %1209 = vmatprep.mubr.msk.f32.mxu0 %vm1274_vm1, %v1273_v2  ;;  %v445_v52 = vpop.permute.xlu1 %444  ;;  %1212 = vmatprep.subr.mxu1 %v1273_v2 }
 0x1e8   :  { %1217 = vmatprep.subr.mxu0 %v1273_v2  ;;  %447 = vst.msk [vmem:[#allocation2 + $0x28] sm:$0xff] %vm429_vm5, %v445_v52  ;;  %1205 = vmatmul.mubr.msk.f32.vlgmr.msra.gmra.mrb[6].mxu1 %vm17_vm0, %v697_v53 }
 0x1e9   :  { %1213 = vmatpush3.msra.mxu1 %v1137_v51  ;;  %1214 = vmatprep.mubr.msk.f32.mxu1 %vm1274_vm1, %v1273_v2 }
 0x1ea   :  { %1222 = vmatprep.subr.mxu1 %v1273_v2 }
 0x1eb   :  { %v449_v55 = vpop.permute.xlu1 %448  ;;  %v779_v56 = vld [vmem:[#allocation2 + $0x20] sm:$0xff] }
 0x1ec   :  { %451 = vst.msk [vmem:[#allocation2 + $0x30] sm:$0xff] %vm429_vm5, %v449_v55  ;;  %1210 = vmatmul.mubr.msk.f32.vlgmr.msra.gmra.mrb[8].mxu0 %vm17_vm0, %v779_v56 }
 0x1ed   :  { %1218 = vmatpush3.msra.mxu0 %v1139_v54  ;;  %1219 = vmatprep.mubr.msk.f32.mxu0 %vm1274_vm1, %v1273_v2 }
 0x1ef   :  { %v861_v58 = vld [vmem:[#allocation2 + $0x28] sm:$0xff] }
 0x1f0   :  { %1215 = vmatmul.mubr.msk.f32.vlgmr.msra.gmra.mrb[8].mxu1 %vm17_vm0, %v861_v58 }
 0x1f1   :  { %1223 = vmatpush3.msra.mxu1 %v1141_v57  ;;  %1224 = vmatprep.mubr.msk.f32.mxu1 %vm1274_vm1, %v1273_v2 }
 0x1f3   :  { %v943_v59 = vld [vmem:[#allocation2 + $0x30] sm:$0xff] }
 0x1f4   :  { %1220 = vmatmul.mubr.msk.f32.vlgmr.msra.gmra.mrb[10].mxu0 %vm17_vm0, %v943_v59  ;;  %1225 = vmatmul.mubr.msk.f32.vlgmr.msra.gmra.mrb[10].mxu1 %vm17_vm0, %v1025_v60 }
 0x2b4   :  { %v527_v61 = vpop.f32.mrb[4].mxu0 }
 0x2b5   :  { %532 = vst.msk [vmem:[#allocation3] sm:$0xff] %vm531_vm6, %v527_v61  ;;  %v1191_v62 = vpop.f32.mrb[5].mxu0 }
 0x2b7   :  { %v605_v63 = vpop.f32.mrb[4].mxu1 }
 0x2b8   :  { %v687_v0 = vpop.f32.mrb[6].mxu0  ;;  %610 = vrot.lane.b32.xlu1 %v605_v63, %s1284_s30  ;;  %v1196_v1 = vpop.f32.mrb[5].mxu1 }
 0x2b9   :  { %692 = vrot.lane.b32.xlu0 %v687_v0, %s1286_s2  ;;  %v1201_v3 = vpop.f32.mrb[7].mxu0 }
 0x2bb   :  { %v769_v4 = vpop.f32.mrb[6].mxu1 }
 0x2bc   :  { %774 = vrot.lane.b32.xlu1 %v769_v4, %s1287_s20  ;;  %v1206_v2 = vpop.f32.mrb[7].mxu1 }
 0x2bf   :  { %v851_v5 = vpop.f32.mrb[8].mxu0 }
 0x2c0   :  { %856 = vrot.lane.b32.xlu0 %v851_v5, %s1288_s21  ;;  %v1211_v6 = vpop.f32.mrb[9].mxu0 }
 0x2c3   :  { %v933_v7 = vpop.f32.mrb[8].mxu1 }
 0x2c4   :  { %938 = vrot.lane.b32.xlu1 %v933_v7, %s1289_s22  ;;  %v1216_v8 = vpop.f32.mrb[9].mxu1 }
 0x2c7   :  { %v1015_v9 = vpop.f32.mrb[10].mxu0  ;;  %v1097_v10 = vpop.f32.mrb[10].mxu1 }
 0x2c8   :  { %1102 = vrot.lane.b32.xlu1 %v1097_v10, %s1290_s23  ;;  %v1226_v11 = vpop.f32.mrb[11].mxu1  ;;  %1020 = vrot.lane.b32.xlu0 %v1015_v9, %s1291_s1  ;;  %v1221_v12 = vpop.f32.mrb[11].mxu0 }
 0x32a   :  { %v611_v13 = vpop.permute.xlu1 %610 }
 0x32b   :  { %v693_v14 = vpop.permute.xlu0 %692  ;;  %614 = vst.msk [vmem:[#allocation3] sm:$0xff] %vm613_vm7, %v611_v13 }
 0x32c   :  { %696 = vst.msk [vmem:[#allocation3] sm:$0xff] %vm695_vm8, %v693_v14 }
 0x32e   :  { %v775_v15 = vpop.permute.xlu1 %774 }
 0x32f   :  { %778 = vst.msk [vmem:[#allocation3] sm:$0xff] %vm777_vm9, %v775_v15 }
 0x332   :  { %v857_v16 = vpop.permute.xlu0 %856 }
 0x333   :  { %860 = vst.msk [vmem:[#allocation3] sm:$0xff] %vm859_vm10, %v857_v16 }
 0x336   :  { %v939_v17 = vpop.permute.xlu1 %938 }
 0x337   :  { %942 = vst.msk [vmem:[#allocation3] sm:$0xff] %vm941_vm11, %v939_v17 }
 0x33a   :  { %v1103_v18 = vpop.permute.xlu1 %1102  ;;  %v1021_v19 = vpop.permute.xlu0 %1020 }
 0x33b   :  { %1024 = vst.msk [vmem:[#allocation3] sm:$0xff] %vm1023_vm12, %v1021_v19 }
 0x33c   :  { %1106 = vst.msk [vmem:[#allocation3] sm:$0xff] %vm1105_vm13, %v1103_v18 }
 0x33d   :  { %1259 = shalt.err (!%p1256_p4)
}
 0x33e   :  { %s1260_s29 = scalar_lea.hbm %s1475_s3, 128 }
 0x33f   :  { %p1261_p5 = scmp.ne.s32.totalorder %s1475_s3, %s1260_s29  ;;  %p1264_p6 = scmp.lt.u32.totalorder %s1260_s29, %s1475_s3 }
 0x341   :  { %p1266_p7 = pnand %p1264_p6, %p1261_p5 }
 0x343   :  { %1269 = shalt.err (!%p1266_p7)
}
 0x344   :  { %1116 = dma.vmem_to_hbm [thread:$0]  %s1114_s25, 128, %s1475_s3, [#allocation4]  }
 0x345   :  { %1270 = dma.done.wait [#allocation4], 128  }
 0x346   :  { %1271 = vsyncadd [#allocation4], 4294967168 }
 0x347   :  { %1120 = vsyncpa [#allocation4], 1 }

// kernel: tpu_custom_call.1
= control target key start
LH: loop header
LB: loop body
LE: loop exit
PB: predicated region body
PF: predicated region fallthrough
CT: control target
= control target key end

     0   :  { %vm17_vm0 = vcmask 64512   ;;  %s1272_s16 = smov 120   ;;  %v1273_v2 = vmov 0.0   ;;  %vm1274_vm1 = vmmov 0   ;;  %s1472_s0 = inlined_call_operand.vmem [shape: f32[8,32], index: 0, kind: input, shape index: {}]   ;;  %s1473_s1 = inlined_call_operand.vmem [shape: f32[4,8,16], index: 1, kind: input, shape index: {}]   ;;  %s1474_s2 = inlined_call_operand.vmem [shape: f32[8,8,4], index: 2, kind: input, shape index: {}]   ;;  %s1475_s3 = inlined_call_operand.hbm [shape: f32[8,32], index: 3, kind: output, shape index: {}]  }
   0x1   :  { %v129_v0 = vld [vmem:[%s1472_s0] sm:$0xff]  ;;  %1167 = vmatprep.subr.mxu0 %v1273_v2  ;;  %1169 = vmatprep.mubr.msk.f32.mxu0 %vm1274_vm1, %v1273_v2  ;;  %v1122_v3 = vld [vmem:[%s1473_s1 + $0x8] sm:$0xff] }
   0x2   :  { %v16_v1 = vld [vmem:[%s1473_s1] sm:$0xff]  ;;  %133 = vrot.lane.b32.xlu0 %v129_v0, %s1272_s16 }
   0x3   :  { %1168 = vmatpush3.msra.mxu0 %v16_v1 }
   0x4   :  { %8 = vsyncpa [#allocation4], 0  ;;  %1170 = vmatmul.mubr.msk.f32.vlgmr.msra.gmra.mrb[0].mxu0 %vm17_vm0, %v129_v0  ;;  %s1275_s0 = smov 104   ;;  %1172 = vmatprep.subr.mxu1 %v1273_v2  ;;  %v1124_v4 = vld [vmem:[%s1473_s1 + $0x10] sm:$0xff]  ;;  %s1276_s21 = smov 112   ;;  %v1126_v5 = vld [vmem:[%s1473_s1 + $0x18] sm:$0xff] }
   0x5   :  { %351 = vrot.lane.b32.xlu1 %v129_v0, %s1275_s0  ;;  %1174 = vmatprep.mubr.msk.f32.mxu1 %vm1274_vm1, %v1273_v2  ;;  %vm91_vm2 = vcmask 15360   ;;  %s1277_s1 = smov 126   ;;  %s1278_s24 = smov 124   ;;  %vm211_vm3 = vcmask 31760   ;;  %v457_v24 = vld [vmem:[%s1474_s2] sm:$0xff]  ;;  %v1129_v25 = vld [vmem:[%s1474_s2 + $0x8] sm:$0xff] }
   0x6   :  { %242 = vrot.lane.b32.xlu0 %v129_v0, %s1276_s21  ;;  %1173 = vmatpush3.msra.mxu1 %v1122_v3  ;;  %s1279_s25 = smov 122   ;;  %s1280_s26 = smov 118   ;;  %vm320_vm4 = vcmask 48160   ;;  %vm429_vm5 = vcmask 64560   ;;  %v1131_v43 = vld [vmem:[%s1474_s2 + $0x10] sm:$0xff]  ;;  %v1133_v46 = vld [vmem:[%s1474_s2 + $0x18] sm:$0xff] }
   0x7   :  { %1177 = vmatprep.subr.mxu0 %v1273_v2  ;;  %1179 = vmatprep.mubr.msk.f32.mxu0 %vm1274_vm1, %v1273_v2  ;;  %s1281_s27 = smov 116   ;;  %s1282_s28 = smov 114   ;;  %v1135_v50 = vld [vmem:[%s1474_s2 + $0x20] sm:$0xff]  ;;  %v1137_v51 = vld [vmem:[%s1474_s2 + $0x28] sm:$0xff]  ;;  %v1139_v54 = vld [vmem:[%s1474_s2 + $0x30] sm:$0xff]  ;;  %vm531_vm6 = vcmask 31744  }
   0x8   :  { %1178 = vmatpush3.msra.mxu0 %v1124_v4  ;;  %1182 = vmatprep.subr.mxu1 %v1273_v2  ;;  %s1283_s29 = smov 2   ;;  %s1284_s30 = smov 4   ;;  %v1141_v57 = vld [vmem:[%s1474_s2 + $0x38] sm:$0xff]  ;;  %vm613_vm7 = vcmask 64544   ;;  %vm695_vm8 = vcmask 97344   ;;  %vm777_vm9 = vcmask 130144  }
   0x9   :  { %1187 = vmatprep.subr.mxu0 %v1273_v2  ;;  %s1285_s8 = smov 6   ;;  %s1286_s2 = smov 8   ;;  %vm859_vm10 = vcmask 162944   ;;  %vm941_vm11 = vcmask 195744   ;;  %vm1023_vm12 = vcmask 228544   ;;  %vm1105_vm13 = vcmask 261344  }
   0xa   :  { %s1287_s20 = smov 12   ;;  %s1288_s21 = smov 16  }
   0xb   :  { %s1289_s22 = smov 20   ;;  %s1290_s23 = smov 28  }
  0x74   :  { %v134_v6 = vpop.permute.xlu0 %133 }
  0x75   :  { %1175 = vmatmul.mubr.msk.f32.vlgmr.msra.gmra.mrb[0].mxu1 %vm17_vm0, %v134_v6 }
  0x76   :  { %1183 = vmatpush3.msra.mxu1 %v1126_v5  ;;  %1184 = vmatprep.mubr.msk.f32.mxu1 %vm1274_vm1, %v1273_v2 }
  0x77   :  { %v352_v7 = vpop.permute.xlu1 %351  ;;  %1192 = vmatprep.subr.mxu1 %v1273_v2 }
  0x78   :  { %v243_v8 = vpop.permute.xlu0 %242 }
  0x79   :  { %1180 = vmatmul.mubr.msk.f32.vlgmr.msra.gmra.mrb[2].mxu0 %vm17_vm0, %v243_v8  ;;  %1185 = vmatmul.mubr.msk.f32.vlgmr.msra.gmra.mrb[2].mxu1 %vm17_vm0, %v352_v7 }
  0x7a   :  { %1189 = vmatprep.mubr.msk.f32.mxu0 %vm1274_vm1, %v1273_v2  ;;  %1194 = vmatprep.mubr.msk.f32.mxu1 %vm1274_vm1, %v1273_v2 }
  0x7b   :  { %1188 = vmatpush3.msra.mxu0 %v457_v24  ;;  %1193 = vmatpush3.msra.mxu1 %v1129_v25 }
  0x7c   :  { %1197 = vmatprep.subr.mxu0 %v1273_v2  ;;  %1202 = vmatprep.subr.mxu1 %v1273_v2 }
  0xd7   :  { %v87_v9 = vpop.f32.mrb[0].mxu0 }
  0xd8   :  { %94 = vrot.lane.b32.xlu1 %v87_v9, %s1277_s1  ;;  %99 = vrot.lane.b32.xlu0 %v87_v9, %s1278_s24  ;;  %v1171_v10 = vpop.f32.mrb[1].mxu0  ;;  %92 = vst.msk [vmem:[#allocation2] sm:$0xff] %vm91_vm2, %v87_v9 }
  0xdc   :  { %104 = vrot.lane.b32.xlu0 %v87_v9, %s1279_s25  ;;  %109 = vrot.lane.b32.xlu1 %v87_v9, %s1272_s16 }
  0xe0   :  { %114 = vrot.lane.b32.xlu0 %v87_v9, %s1280_s26 }
  0xe4   :  { %119 = vrot.lane.b32.xlu0 %v87_v9, %s1281_s27 }
  0xe8   :  { %124 = vrot.lane.b32.xlu0 %v87_v9, %s1282_s28 }
 0x148   :  { %v203_v11 = vpop.f32.mrb[0].mxu1 }
 0x149   :  { %v1176_v12 = vpop.f32.mrb[1].mxu1  ;;  %208 = vrot.lane.b32.xlu0 %v203_v11, %s1283_s29 }
 0x14a   :  { %v95_v13 = vpop.permute.xlu1 %94  ;;  %v100_v14 = vpop.permute.xlu0 %99 }
 0x14b   :  { %98 = vst.msk [vmem:[#allocation2 + $0x8] sm:$0xff] %vm91_vm2, %v95_v13  ;;  %103 = vst.msk [vmem:[#allocation2 + $0x10] sm:$0xff] %vm91_vm2, %v100_v14 }
 0x14c   :  { %213 = vst.msk [vmem:[#allocation2 + $0x8] sm:$0xff] %vm211_vm3, %v203_v11  ;;  %v312_v15 = vpop.f32.mrb[2].mxu0  ;;  %v421_v16 = vpop.f32.mrb[2].mxu1 }
 0x14d   :  { %322 = vrot.lane.b32.xlu0 %v312_v15, %s1283_s29  ;;  %317 = vrot.lane.b32.xlu1 %v312_v15, %s1284_s30  ;;  %v1181_v17 = vpop.f32.mrb[3].mxu0  ;;  %v1186_v18 = vpop.f32.mrb[3].mxu1 }
 0x14e   :  { %v105_v19 = vpop.permute.xlu0 %104  ;;  %v110_v20 = vpop.permute.xlu1 %109 }
 0x14f   :  { %108 = vst.msk [vmem:[#allocation2 + $0x18] sm:$0xff] %vm91_vm2, %v105_v19  ;;  %113 = vst.msk [vmem:[#allocation2 + $0x20] sm:$0xff] %vm91_vm2, %v110_v20 }
 0x151   :  { %218 = vrot.lane.b32.xlu0 %v203_v11, %s1278_s24  ;;  %214 = vrot.lane.b32.xlu1 %v203_v11, %s1277_s1 }
 0x152   :  { %v115_v21 = vpop.permute.xlu0 %114 }
 0x153   :  { %118 = vst.msk [vmem:[#allocation2 + $0x28] sm:$0xff] %vm91_vm2, %v115_v21 }
 0x155   :  { %226 = vrot.lane.b32.xlu0 %v203_v11, %s1272_s16  ;;  %327 = vrot.lane.b32.xlu1 %v312_v15, %s1277_s1 }
 0x156   :  { %v120_v22 = vpop.permute.xlu0 %119 }
 0x157   :  { %123 = vst.msk [vmem:[#allocation2 + $0x30] sm:$0xff] %vm91_vm2, %v120_v22 }
 0x159   :  { %335 = vrot.lane.b32.xlu0 %v312_v15, %s1279_s25  ;;  %222 = vrot.lane.b32.xlu1 %v203_v11, %s1279_s25 }
 0x15a   :  { %v125_v23 = vpop.permute.xlu0 %124 }
 0x15b   :  { %128 = vst.msk [vmem:[#allocation2 + $0x38] sm:$0xff] %vm91_vm2, %v125_v23 }
 0x15d   :  { %435 = vrot.lane.b32.xlu0 %v421_v16, %s1283_s29  ;;  %331 = vrot.lane.b32.xlu1 %v312_v15, %s1278_s24 }
 0x161   :  { %234 = vrot.lane.b32.xlu0 %v203_v11, %s1281_s27  ;;  %230 = vrot.lane.b32.xlu1 %v203_v11, %s1280_s26 }
 0x165   :  { %343 = vrot.lane.b32.xlu0 %v312_v15, %s1280_s26  ;;  %426 = vrot.lane.b32.xlu1 %v421_v16, %s1285_s8 }
 0x169   :  { %452 = vrot.lane.b32.xlu0 %v421_v16, %s1272_s16  ;;  %431 = vrot.lane.b32.xlu1 %v421_v16, %s1284_s30 }
 0x16d   :  { %339 = vrot.lane.b32.xlu1 %v312_v15, %s1272_s16 }
 0x171   :  { %440 = vrot.lane.b32.xlu1 %v421_v16, %s1277_s1  ;;  %s1291_s1 = smov 24  }
 0x175   :  { %444 = vrot.lane.b32.xlu1 %v421_v16, %s1278_s24  ;;  %s1292_s24 = smov [#allocation3]  }
 0x179   :  { %448 = vrot.lane.b32.xlu1 %v421_v16, %s1279_s25  ;;  %s1113_s25 = sshll.u32 %s1292_s24, 4  ;;  %s1114_s25 = int_to_ptr.vmem [resolvable:$true] %s1113_s25 }
 0x17a   :  { %s1248_s26 = scalar_lea.vmem %s1114_s25, 128  ;;  %p1253_p1 = scmp.lt.s32.totalorder %s1114_s25, %s1114_s25 }
 0x17b   :  { %p1249_p0 = scmp.ne.s32.totalorder %s1114_s25, %s1248_s26  ;;  %p1254_p2 = scmp.lt.s32.totalorder %s1248_s26, %s1248_s26 }
 0x17d   :  { %p1255_p3 = por %p1254_p2, %p1253_p1 }
 0x17f   :  { %p1256_p4 = pnand %p1255_p3, %p1249_p0 }
 0x1bb   :  { %v209_v26 = vpop.permute.xlu0 %208 }
 0x1bc   :  { %212 = vst.msk [vmem:[#allocation2] sm:$0xff] %vm211_vm3, %v209_v26 }
 0x1bf   :  { %v323_v27 = vpop.permute.xlu0 %322  ;;  %v318_v28 = vpop.permute.xlu1 %317 }
 0x1c0   :  { %325 = vst.msk [vmem:[#allocation2 + $0x8] sm:$0xff] %vm320_vm4, %v323_v27  ;;  %321 = vst.msk [vmem:[#allocation2] sm:$0xff] %vm320_vm4, %v318_v28 }
 0x1c3   :  { %v219_v29 = vpop.permute.xlu0 %218  ;;  %v215_v30 = vpop.permute.xlu1 %214 }
 0x1c4   :  { %221 = vst.msk [vmem:[#allocation2 + $0x18] sm:$0xff] %vm211_vm3, %v219_v29  ;;  %217 = vst.msk [vmem:[#allocation2 + $0x10] sm:$0xff] %vm211_vm3, %v215_v30 }
 0x1c5   :  { %326 = vst.msk [vmem:[#allocation2 + $0x10] sm:$0xff] %vm320_vm4, %v312_v15 }
 0x1c7   :  { %v227_v31 = vpop.permute.xlu0 %226  ;;  %v328_v32 = vpop.permute.xlu1 %327 }
 0x1c8   :  { %229 = vst.msk [vmem:[#allocation2 + $0x28] sm:$0xff] %vm211_vm3, %v227_v31 }
 0x1c9   :  { %330 = vst.msk [vmem:[#allocation2 + $0x18] sm:$0xff] %vm320_vm4, %v328_v32 }
 0x1ca   :  { %439 = vst.msk [vmem:[#allocation2 + $0x18] sm:$0xff] %vm429_vm5, %v421_v16 }
 0x1cb   :  { %v336_v33 = vpop.permute.xlu0 %335  ;;  %v223_v34 = vpop.permute.xlu1 %222 }
 0x1cc   :  { %338 = vst.msk [vmem:[#allocation2 + $0x28] sm:$0xff] %vm320_vm4, %v336_v33 }
 0x1cd   :  { %225 = vst.msk [vmem:[#allocation2 + $0x20] sm:$0xff] %vm211_vm3, %v223_v34 }
 0x1cf   :  { %v436_v35 = vpop.permute.xlu0 %435  ;;  %v332_v36 = vpop.permute.xlu1 %331 }
 0x1d0   :  { %438 = vst.msk [vmem:[#allocation2 + $0x10] sm:$0xff] %vm429_vm5, %v436_v35 }
 0x1d1   :  { %334 = vst.msk [vmem:[#allocation2 + $0x20] sm:$0xff] %vm320_vm4, %v332_v36  ;;  %v697_v53 = vld [vmem:[#allocation2 + $0x18] sm:$0xff] }
 0x1d3   :  { %v235_v37 = vpop.permute.xlu0 %234  ;;  %v231_v38 = vpop.permute.xlu1 %230 }
 0x1d4   :  { %237 = vst.msk [vmem:[#allocation2 + $0x38] sm:$0xff] %vm211_vm3, %v235_v37  ;;  %233 = vst.msk [vmem:[#allocation2 + $0x30] sm:$0xff] %vm211_vm3, %v231_v38 }
 0x1d7   :  { %v344_v39 = vpop.permute.xlu0 %343  ;;  %v427_v40 = vpop.permute.xlu1 %426  ;;  %v615_v49 = vld [vmem:[#allocation2 + $0x10] sm:$0xff] }
 0x1d8   :  { %346 = vst.msk [vmem:[#allocation2 + $0x38] sm:$0xff] %vm320_vm4, %v344_v39 }
 0x1d9   :  { %430 = vst.msk [vmem:[#allocation2] sm:$0xff] %vm429_vm5, %v427_v40 }
 0x1db   :  { %v453_v41 = vpop.permute.xlu0 %452  ;;  %v432_v42 = vpop.permute.xlu1 %431 }
 0x1dc   :  { %455 = vst.msk [vmem:[#allocation2 + $0x38] sm:$0xff] %vm429_vm5, %v453_v41  ;;  %434 = vst.msk [vmem:[#allocation2 + $0x8] sm:$0xff] %vm429_vm5, %v432_v42 }
 0x1df   :  { %v340_v44 = vpop.permute.xlu1 %339 }
 0x1e0   :  { %v456_v45 = vld [vmem:[#allocation2] sm:$0xff]  ;;  %342 = vst.msk [vmem:[#allocation2 + $0x30] sm:$0xff] %vm320_vm4, %v340_v44 }
 0x1e1   :  { %1190 = vmatmul.mubr.msk.f32.vlgmr.msra.gmra.mrb[4].mxu0 %vm17_vm0, %v456_v45 }
 0x1e2   :  { %1198 = vmatpush3.msra.mxu0 %v1131_v43  ;;  %1199 = vmatprep.mubr.msk.f32.mxu0 %vm1274_vm1, %v1273_v2 }
 0x1e3   :  { %1207 = vmatprep.subr.mxu0 %v1273_v2  ;;  %v441_v47 = vpop.permute.xlu1 %440  ;;  %v533_v48 = vld [vmem:[#allocation2 + $0x8] sm:$0xff]  ;;  %v1025_v60 = vld [vmem:[#allocation2 + $0x38] sm:$0xff] }
 0x1e4   :  { %443 = vst.msk [vmem:[#allocation2 + $0x20] sm:$0xff] %vm429_vm5, %v441_v47  ;;  %1195 = vmatmul.mubr.msk.f32.vlgmr.msra.gmra.mrb[4].mxu1 %vm17_vm0, %v533_v48 }
 0x1e5   :  { %1200 = vmatmul.mubr.msk.f32.vlgmr.msra.gmra.mrb[6].mxu0 %vm17_vm0, %v615_v49  ;;  %1203 = vmatpush3.msra.mxu1 %v1133_v46 }
 0x1e6   :  { %1204 = vmatprep.mubr.msk.f32.mxu1 %vm1274_vm1, %v1273_v2  ;;  %1208 = vmatpush3.msra.mxu0 %v1135_v50 }
 0x1e7   :  { %1209 = vmatprep.mubr.msk.f32.mxu0 %vm1274_vm1, %v1273_v2  ;;  %v445_v52 = vpop.permute.xlu1 %444  ;;  %1212 = vmatprep.subr.mxu1 %v1273_v2 }
 0x1e8   :  { %1217 = vmatprep.subr.mxu0 %v1273_v2  ;;  %447 = vst.msk [vmem:[#allocation2 + $0x28] sm:$0xff] %vm429_vm5, %v445_v52  ;;  %1205 = vmatmul.mubr.msk.f32.vlgmr.msra.gmra.mrb[6].mxu1 %vm17_vm0, %v697_v53 }
 0x1e9   :  { %1213 = vmatpush3.msra.mxu1 %v1137_v51  ;;  %1214 = vmatprep.mubr.msk.f32.mxu1 %vm1274_vm1, %v1273_v2 }
 0x1ea   :  { %1222 = vmatprep.subr.mxu1 %v1273_v2 }
 0x1eb   :  { %v449_v55 = vpop.permute.xlu1 %448  ;;  %v779_v56 = vld [vmem:[#allocation2 + $0x20] sm:$0xff] }
 0x1ec   :  { %451 = vst.msk [vmem:[#allocation2 + $0x30] sm:$0xff] %vm429_vm5, %v449_v55  ;;  %1210 = vmatmul.mubr.msk.f32.vlgmr.msra.gmra.mrb[8].mxu0 %vm17_vm0, %v779_v56 }
 0x1ed   :  { %1218 = vmatpush3.msra.mxu0 %v1139_v54  ;;  %1219 = vmatprep.mubr.msk.f32.mxu0 %vm1274_vm1, %v1273_v2 }
 0x1ef   :  { %v861_v58 = vld [vmem:[#allocation2 + $0x28] sm:$0xff] }
 0x1f0   :  { %1215 = vmatmul.mubr.msk.f32.vlgmr.msra.gmra.mrb[8].mxu1 %vm17_vm0, %v861_v58 }
 0x1f1   :  { %1223 = vmatpush3.msra.mxu1 %v1141_v57  ;;  %1224 = vmatprep.mubr.msk.f32.mxu1 %vm1274_vm1, %v1273_v2 }
 0x1f3   :  { %v943_v59 = vld [vmem:[#allocation2 + $0x30] sm:$0xff] }
 0x1f4   :  { %1220 = vmatmul.mubr.msk.f32.vlgmr.msra.gmra.mrb[10].mxu0 %vm17_vm0, %v943_v59  ;;  %1225 = vmatmul.mubr.msk.f32.vlgmr.msra.gmra.mrb[10].mxu1 %vm17_vm0, %v1025_v60 }
 0x2b4   :  { %v527_v61 = vpop.f32.mrb[4].mxu0 }
 0x2b5   :  { %532 = vst.msk [vmem:[#allocation3] sm:$0xff] %vm531_vm6, %v527_v61  ;;  %v1191_v62 = vpop.f32.mrb[5].mxu0 }
 0x2b7   :  { %v605_v63 = vpop.f32.mrb[4].mxu1 }
 0x2b8   :  { %v687_v0 = vpop.f32.mrb[6].mxu0  ;;  %610 = vrot.lane.b32.xlu1 %v605_v63, %s1284_s30  ;;  %v1196_v1 = vpop.f32.mrb[5].mxu1 }
 0x2b9   :  { %692 = vrot.lane.b32.xlu0 %v687_v0, %s1286_s2  ;;  %v1201_v3 = vpop.f32.mrb[7].mxu0 }
 0x2bb   :  { %v769_v4 = vpop.f32.mrb[6].mxu1 }
 0x2bc   :  { %774 = vrot.lane.b32.xlu1 %v769_v4, %s1287_s20  ;;  %v1206_v2 = vpop.f32.mrb[7].mxu1 }
 0x2bf   :  { %v851_v5 = vpop.f32.mrb[8].mxu0 }
 0x2c0   :  { %856 = vrot.lane.b32.xlu0 %v851_v5, %s1288_s21  ;;  %v1211_v6 = vpop.f32.mrb[9].mxu0 }
 0x2c3   :  { %v933_v7 = vpop.f32.mrb[8].mxu1 }
 0x2c4   :  { %938 = vrot.lane.b32.xlu1 %v933_v7, %s1289_s22  ;;  %v1216_v8 = vpop.f32.mrb[9].mxu1 }
 0x2c7   :  { %v1015_v9 = vpop.f32.mrb[10].mxu0  ;;  %v1097_v10 = vpop.f32.mrb[10].mxu1 }
 0x2c8   :  { %1102 = vrot.lane.b32.xlu1 %v1097_v10, %s1290_s23  ;;  %v1226_v11 = vpop.f32.mrb[11].mxu1  ;;  %1020 = vrot.lane.b32.xlu0 %v1015_v9, %s1291_s1  ;;  %v1221_v12 = vpop.f32.mrb[11].mxu0 }
 0x32a   :  { %v611_v13 = vpop.permute.xlu1 %610 }
 0x32b   :  { %v693_v14 = vpop.permute.xlu0 %692  ;;  %614 = vst.msk [vmem:[#allocation3] sm:$0xff] %vm613_vm7, %v611_v13 }
 0x32c   :  { %696 = vst.msk [vmem:[#allocation3] sm:$0xff] %vm695_vm8, %v693_v14 }
 0x32e   :  { %v775_v15 = vpop.permute.xlu1 %774 }
 0x32f   :  { %778 = vst.msk [vmem:[#allocation3] sm:$0xff] %vm777_vm9, %v775_v15 }
 0x332   :  { %v857_v16 = vpop.permute.xlu0 %856 }
 0x333   :  { %860 = vst.msk [vmem:[#allocation3] sm:$0xff] %vm859_vm10, %v857_v16 }
 0x336   :  { %v939_v17 = vpop.permute.xlu1 %938 }
 0x337   :  { %942 = vst.msk [vmem:[#allocation3] sm:$0xff] %vm941_vm11, %v939_v17 }
 0x33a   :  { %v1103_v18 = vpop.permute.xlu1 %1102  ;;  %v1021_v19 = vpop.permute.xlu0 %1020 }
 0x33b   :  { %1024 = vst.msk [vmem:[#allocation3] sm:$0xff] %vm1023_vm12, %v1021_v19 }
 0x33c   :  { %1106 = vst.msk [vmem:[#allocation3] sm:$0xff] %vm1105_vm13, %v1103_v18 }
 0x33d   :  { %1259 = shalt.err (!%p1256_p4)
}
 0x33e   :  { %s1260_s29 = scalar_lea.hbm %s1475_s3, 128 }
 0x33f   :  { %p1261_p5 = scmp.ne.s32.totalorder %s1475_s3, %s1260_s29  ;;  %p1264_p6 = scmp.lt.u32.totalorder %s1260_s29, %s1475_s3 }
 0x341   :  { %p1266_p7 = pnand %p1264_p6, %p1261_p5 }
 0x343   :  { %1269 = shalt.err (!%p1266_p7)
}
 0x344   :  { %1116 = dma.vmem_to_hbm [thread:$0]  %s1114_s25, 128, %s1475_s3, [#allocation4]  }
 0x345   :  { %1270 = dma.done.wait [#allocation4], 128  }
 0x346   :  { %1271 = vsyncadd [#allocation4], 4294967168 }
 0x347   :  { %1120 = vsyncpa [#allocation4], 1 }

</bundles_post_ra>
